<compile_context>
chip_gen: v7x
topology: tpu7x:2x2x1
jax: 0.10.0
libtpu: 0.0.40
codegen_flags: <defaults>
</compile_context>

<pallas_src>
import functools

import jax
import jax.numpy as jnp
from jax import lax
from jax.experimental import pallas as pl
from jax.experimental.pallas import tpu as pltpu


def _round_up(n, m):
    return ((n + m - 1) // m) * m


# ---------------------------------------------------------------------------
# Fused kernel: per time chunk -> input projection, TT recurrent steps,
# output projection.  h persists across grid steps in VMEM scratch.
# ---------------------------------------------------------------------------
def _gru_fused_kernel(x_ref, wgx_ref, bg_ref, wzrh_ref, wnh_ref, wo_ref, bo_ref,
                      out_ref, hs_ref, h_scr, gx_scr, *, tt, bp, lp):
    @pl.when(pl.program_id(0) == 0)
    def _():
        h_scr[...] = jnp.zeros_like(h_scr)

    ip = x_ref.shape[-1]
    op = wo_ref.shape[-1]

    # --- Fused input projection for the whole chunk (one lane-dense MXU dot).
    x2 = x_ref[...].reshape(tt * bp, ip).astype(jnp.bfloat16)
    gx = (jnp.dot(x2, wgx_ref[...], preferred_element_type=jnp.float32)
          + bg_ref[...])                                   # (TT*BP, 3*LP), f32
    gx_scr[...] = gx.reshape(tt, bp, 3 * lp)

    # --- Sequential recurrence over the chunk (h carried in VMEM scratch).
    def step(i, h):
        gx_i = gx_scr[i]                                   # (BP, 3*LP): [z|r|n]
        # Fused recurrent z/r matmul: one dot with N = 2*LP.
        zr = jnp.dot(h.astype(jnp.bfloat16), wzrh_ref[...],
                     preferred_element_type=jnp.float32)
        z = jax.nn.sigmoid(gx_i[:, :lp] + zr[:, :lp])
        r = jax.nn.sigmoid(gx_i[:, lp:2 * lp] + zr[:, lp:])
        n = jnp.tanh(gx_i[:, 2 * lp:]
                     + jnp.dot((r * h).astype(jnp.bfloat16), wnh_ref[...],
                               preferred_element_type=jnp.float32))
        h_new = h + z * (n - h)                            # == (1-z)*h + z*n
        hs_ref[i] = h_new
        return h_new

    h_scr[...] = lax.fori_loop(0, tt, step, h_scr[...],
                               unroll=True if tt <= 8 else 8)

    # --- Fused output projection over the whole chunk (lane-dense output slab).
    hsc = hs_ref[...].reshape(tt * bp, lp).astype(jnp.bfloat16)
    out = (jnp.dot(hsc, wo_ref[...], preferred_element_type=jnp.float32)
           + bo_ref[...])
    out_ref[...] = out.reshape(tt, bp, op)


# ---------------------------------------------------------------------------
# Wrapper: padding, weight fusion / bf16 cast, single fused pallas_call.
# ---------------------------------------------------------------------------
def gru_forward(x, params, time_chunk=16):
    """x: (T, B, input_dim) float32.  Returns (outputs, hidden_states)."""
    T, B, input_dim = x.shape
    latent_dim = params["wzh"].shape[0]
    output_dim = params["wo"].shape[1]

    LP = _round_up(latent_dim, 128)     # lane-aligned latent
    IP = _round_up(input_dim, 128)      # lane-aligned input
    OP = _round_up(output_dim, 128)     # lane-aligned output
    BP = _round_up(B, 8)                # sublane-aligned batch
    TT = min(time_chunk, T)             # timesteps per grid step
    TP = _round_up(T, TT)

    def pad2(a, rows, cols):
        return jnp.pad(a, ((0, rows - a.shape[0]), (0, cols - a.shape[1])))

    # Fused, padded x-side gate weights / biases (order [z | r | n]); bf16 MXU
    # operands, f32 biases.
    wgx = jnp.concatenate([pad2(params["wzx"], IP, LP),
                           pad2(params["wrx"], IP, LP),
                           pad2(params["wnx"], IP, LP)], axis=1).astype(jnp.bfloat16)
    bg = jnp.concatenate([pad2(params["bz"], 1, LP),
                          pad2(params["br"], 1, LP),
                          pad2(params["bn"], 1, LP)], axis=1)

    # Fused recurrent z/r weights; candidate weight stays separate (needs r*h).
    wzrh = jnp.concatenate([pad2(params["wzh"], LP, LP),
                            pad2(params["wrh"], LP, LP)], axis=1).astype(jnp.bfloat16)
    wnh = pad2(params["wnh"], LP, LP).astype(jnp.bfloat16)

    wo = pad2(params["wo"], LP, OP).astype(jnp.bfloat16)
    bo = pad2(params["bo"], 1, OP)

    # Zero padding: padded latent lanes of h stay exactly zero through the
    # recurrence; padded batch rows / trailing timesteps are sliced off.
    x_p = jnp.pad(x, ((0, TP - T), (0, BP - B), (0, IP - input_dim)))

    # VMEM budget from actual block footprints (double-buffered in/out blocks
    # + scratch), with 2x headroom and an 8 MiB floor, capped at v7x's 64 MiB.
    block_bytes = (
        2 * (TT * BP * IP * 4)              # x chunk (f32)
        + 2 * (IP * 3 * LP * 2)             # wgx (bf16)
        + 2 * (LP * 2 * LP * 2)             # wzrh (bf16)
        + 2 * (LP * LP * 2)                 # wnh (bf16)
        + 2 * (LP * OP * 2)                 # wo (bf16)
        + 2 * (8 * (3 * LP + OP) * 4)       # biases (sublane-padded, f32)
        + 2 * (TT * BP * OP * 4)            # out chunk (f32)
        + 2 * (TT * BP * LP * 4)            # hs chunk (f32)
        + BP * LP * 4                       # h carry scratch
        + TT * BP * 3 * LP * 4)             # gx scratch
    vmem_limit = int(min(64 * 1024 * 1024,
                         max(2 * block_bytes, 8 * 1024 * 1024)))

    kernel = functools.partial(_gru_fused_kernel, tt=TT, bp=BP, lp=LP)
    out_p, hs_p = pl.pallas_call(
        kernel,
        out_shape=(jax.ShapeDtypeStruct((TP, BP, OP), jnp.float32),
                   jax.ShapeDtypeStruct((TP, BP, LP), jnp.float32)),
        grid_spec=pltpu.PrefetchScalarGridSpec(
            num_scalar_prefetch=0,
            grid=(TP // TT,),
            in_specs=[
                pl.BlockSpec((TT, BP, IP), lambda c: (c, 0, 0)),   # x chunk
                pl.BlockSpec((IP, 3 * LP), lambda c: (0, 0)),      # wgx (const)
                pl.BlockSpec((1, 3 * LP), lambda c: (0, 0)),       # bg  (const)
                pl.BlockSpec((LP, 2 * LP), lambda c: (0, 0)),      # wzrh (const)
                pl.BlockSpec((LP, LP), lambda c: (0, 0)),          # wnh (const)
                pl.BlockSpec((LP, OP), lambda c: (0, 0)),          # wo  (const)
                pl.BlockSpec((1, OP), lambda c: (0, 0)),           # bo  (const)
            ],
            out_specs=[
                pl.BlockSpec((TT, BP, OP), lambda c: (c, 0, 0)),   # outputs
                pl.BlockSpec((TT, BP, LP), lambda c: (c, 0, 0)),   # hidden states
            ],
            scratch_shapes=[
                pltpu.VMEM((BP, LP), jnp.float32),                 # h carry
                pltpu.VMEM((TT, BP, 3 * LP), jnp.float32),         # per-chunk gx
            ]),
        compiler_params=pltpu.CompilerParams(
            dimension_semantics=("arbitrary",),   # time is sequential
            vmem_limit_bytes=vmem_limit),
    )(x_p, wgx, bg, wzrh, wnh, wo, bo)

    outputs = out_p[:T, :B, :output_dim]
    hidden_states = hs_p[:T, :B, :latent_dim]
    return outputs, hidden_states


# ---------------------------------------------------------------------------
# Parameters + pure-JAX reference
# ---------------------------------------------------------------------------
def init_params(key, input_dim, latent_dim, output_dim):
    """PyTorch-Linear-like uniform init.  Concatenated-input Linear weights
    are stored pre-split and pre-transposed: W^T = [W_x ; W_h]."""
    ks = jax.random.split(key, 11)
    bound_g = 1.0 / jnp.sqrt(input_dim + latent_dim)
    bound_o = 1.0 / jnp.sqrt(latent_dim)

    def u(k, shape, bound):
        return jax.random.uniform(k, shape, jnp.float32, -bound, bound)

    return {
        "wzx": u(ks[0], (input_dim, latent_dim), bound_g),
        "wzh": u(ks[1], (latent_dim, latent_dim), bound_g),
        "bz": u(ks[2], (1, latent_dim), bound_g),
        "wrx": u(ks[3], (input_dim, latent_dim), bound_g),
        "wrh": u(ks[4], (latent_dim, latent_dim), bound_g),
        "br": u(ks[5], (1, latent_dim), bound_g),
        "wnx": u(ks[6], (input_dim, latent_dim), bound_g),
        "wnh": u(ks[7], (latent_dim, latent_dim), bound_g),
        "bn": u(ks[8], (1, latent_dim), bound_g),
        "wo": u(ks[9], (latent_dim, output_dim), bound_o),
        "bo": u(ks[10], (1, output_dim), bound_o),
    }


def gru_reference(x, params):
    """Pure-JAX f32 reference of the PyTorch forward loop."""
    T, B, _ = x.shape
    latent_dim = params["wzh"].shape[0]
    h = jnp.zeros((B, latent_dim), jnp.float32)
    outs, hs = [], []
    for t in range(T):
        x_t = x[t]
        z = jax.nn.sigmoid(x_t @ params["wzx"] + h @ params["wzh"] + params["bz"])
        r = jax.nn.sigmoid(x_t @ params["wrx"] + h @ params["wrh"] + params["br"])
        h_tilde = jnp.tanh(x_t @ params["wnx"] + (r * h) @ params["wnh"] + params["bn"])
        h = (1 - z) * h + z * h_tilde
        hs.append(h)
        outs.append(h @ params["wo"] + params["bo"])
    return jnp.stack(outs, 0), jnp.stack(hs, 0)


if __name__ == "__main__":
    T, B = 8, 4
    input_dim, latent_dim, output_dim = 8, 32, 16

    key = jax.random.PRNGKey(0)
    kx, kp = jax.random.split(key)
    x = jax.random.normal(kx, (T, B, input_dim), jnp.float32)
    params = init_params(kp, input_dim, latent_dim, output_dim)

    outputs, hidden_states = gru_forward(x, params)
    outputs = jax.block_until_ready(outputs)
    hidden_states = jax.block_until_ready(hidden_states)

    ref_out, ref_hs = gru_reference(x, params)
    assert outputs.shape == (T, B, output_dim)
    assert hidden_states.shape == (T, B, latent_dim)
    # bf16 MXU operands (f32 accumulation) vs. the f32 reference -> tolerance
    # loosened from 1e-4 to 2e-2.
    assert jnp.allclose(outputs, ref_out, atol=2e-2, rtol=2e-2)
    assert jnp.allclose(hidden_states, ref_hs, atol=2e-2, rtol=2e-2)

    print("KERNEL_OK")
</pallas_src>

<mosaic_0001>
module attributes {stable_mosaic.version = 11 : i64} {
  func.func @_gru_fused_kernel(%arg0: i32, %arg1: memref<8x8x128xf32, #tpu.memory_space<vmem>>, %arg2: memref<128x384xbf16, #tpu.memory_space<vmem>>, %arg3: memref<1x384xf32, #tpu.memory_space<vmem>>, %arg4: memref<128x256xbf16, #tpu.memory_space<vmem>>, %arg5: memref<128x128xbf16, #tpu.memory_space<vmem>>, %arg6: memref<128x128xbf16, #tpu.memory_space<vmem>>, %arg7: memref<1x128xf32, #tpu.memory_space<vmem>>, %arg8: memref<8x8x128xf32, #tpu.memory_space<vmem>>, %arg9: memref<8x8x128xf32, #tpu.memory_space<vmem>>, %arg10: memref<8x128xf32, #tpu.memory_space<vmem>>, %arg11: memref<8x8x384xf32, #tpu.memory_space<vmem>>) attributes {dimension_semantics = [#tpu.dimension_semantics<arbitrary>], iteration_bounds = array<i64: 1>, scalar_prefetch = 0 : i64, scratch_operands = 2 : i64, tpu.core_type = #tpu.core_type<tc>, window_params = [{transform_indices = @transform_0, window_bounds = array<i64: 8, 8, 128>}, {pipeline_mode = #tpu.pipeline_mode<synchronous>, transform_indices = @transform_1, window_bounds = array<i64: 128, 384>}, {pipeline_mode = #tpu.pipeline_mode<synchronous>, transform_indices = @transform_2, window_bounds = array<i64: 1, 384>}, {pipeline_mode = #tpu.pipeline_mode<synchronous>, transform_indices = @transform_3, window_bounds = array<i64: 128, 256>}, {pipeline_mode = #tpu.pipeline_mode<synchronous>, transform_indices = @transform_4, window_bounds = array<i64: 128, 128>}, {pipeline_mode = #tpu.pipeline_mode<synchronous>, transform_indices = @transform_5, window_bounds = array<i64: 128, 128>}, {pipeline_mode = #tpu.pipeline_mode<synchronous>, transform_indices = @transform_6, window_bounds = array<i64: 1, 128>}, {transform_indices = @transform_7, window_bounds = array<i64: 8, 8, 128>}, {transform_indices = @transform_8, window_bounds = array<i64: 8, 8, 128>}]} {
    %c0_i32 = arith.constant 0 : i32
    %0 = arith.cmpi eq, %arg0, %c0_i32 : i32
    %1 = arith.extui %0 : i1 to i32
    %c0_i32_0 = arith.constant 0 : i32
    %2 = arith.cmpi ne, %1, %c0_i32_0 : i32
    scf.if %2 {
      %cst_122 = arith.constant 0.000000e+00 : f32
      %313 = vector.broadcast %cst_122 : f32 to vector<8x128xf32>
      %c0_123 = arith.constant 0 : index
      %c0_124 = arith.constant 0 : index
      %314 = vector.load %arg10[%c0_123, %c0_124] : memref<8x128xf32, #tpu.memory_space<vmem>>, vector<8x128xf32>
      tpu.vector_store %arg10[%c0_123, %c0_124], %313 {strides = array<i32>} : memref<8x128xf32, #tpu.memory_space<vmem>>, vector<8x128xf32>,
    } else {
    }
    %c0 = arith.constant 0 : index
    %c0_1 = arith.constant 0 : index
    %c0_2 = arith.constant 0 : index
    %3 = vector.load %arg1[%c0, %c0_1, %c0_2] : memref<8x8x128xf32, #tpu.memory_space<vmem>>, vector<8x8x128xf32>
    %4 = vector.shape_cast %3 : vector<8x8x128xf32> to vector<64x128xf32>
    %5 = arith.truncf %4 : vector<64x128xf32> to vector<64x128xbf16>
    %c0_3 = arith.constant 0 : index
    %c0_4 = arith.constant 0 : index
    %6 = vector.load %arg2[%c0_3, %c0_4] : memref<128x384xbf16, #tpu.memory_space<vmem>>, vector<128x384xbf16>
    %cst = arith.constant dense<0.000000e+00> : vector<64x384xf32>
    %7 = tpu.matmul %5, %6, %cst {dimension_numbers = #tpu.dot_dimension_numbers<[1], [0], [0], [1], [0, 0, 1, 1], [], []>} : vector<64x128xbf16>, vector<128x384xbf16>, vector<64x384xf32> -> vector<64x384xf32>
    %c0_5 = arith.constant 0 : index
    %c0_6 = arith.constant 0 : index
    %8 = vector.load %arg3[%c0_5, %c0_6] : memref<1x384xf32, #tpu.memory_space<vmem>>, vector<1x384xf32>
    %9 = vector.broadcast %8 : vector<1x384xf32> to vector<64x384xf32>
    %10 = arith.addf %7, %9 : vector<64x384xf32>
    %11 = vector.shape_cast %10 : vector<64x384xf32> to vector<8x8x384xf32>
    %c0_7 = arith.constant 0 : index
    %c0_8 = arith.constant 0 : index
    %c0_9 = arith.constant 0 : index
    %12 = vector.load %arg11[%c0_7, %c0_8, %c0_9] : memref<8x8x384xf32, #tpu.memory_space<vmem>>, vector<8x8x384xf32>
    tpu.vector_store %arg11[%c0_7, %c0_8, %c0_9], %11 {strides = array<i32>} : memref<8x8x384xf32, #tpu.memory_space<vmem>>, vector<8x8x384xf32>,
    %c0_10 = arith.constant 0 : index
    %c0_11 = arith.constant 0 : index
    %13 = vector.load %arg10[%c0_10, %c0_11] : memref<8x128xf32, #tpu.memory_space<vmem>>, vector<8x128xf32>
    %c0_i32_12 = arith.constant 0 : i32
    %14 = arith.index_cast %c0_i32_12 : i32 to index
    %c0_13 = arith.constant 0 : index
    %c0_14 = arith.constant 0 : index
    %15 = vector.load %arg11[%14, %c0_13, %c0_14] : memref<8x8x384xf32, #tpu.memory_space<vmem>>, vector<1x8x384xf32>
    %16 = vector.shape_cast %15 : vector<1x8x384xf32> to vector<8x384xf32>
    %17 = arith.truncf %13 : vector<8x128xf32> to vector<8x128xbf16>
    %c0_15 = arith.constant 0 : index
    %c0_16 = arith.constant 0 : index
    %18 = vector.load %arg4[%c0_15, %c0_16] : memref<128x256xbf16, #tpu.memory_space<vmem>>, vector<128x256xbf16>
    %cst_17 = arith.constant dense<0.000000e+00> : vector<8x256xf32>
    %19 = tpu.matmul %17, %18, %cst_17 {dimension_numbers = #tpu.dot_dimension_numbers<[1], [0], [0], [1], [0, 0, 1, 1], [], []>} : vector<8x128xbf16>, vector<128x256xbf16>, vector<8x256xf32> -> vector<8x256xf32>
    %20 = vector.extract_strided_slice %16 {offsets = [0, 0], sizes = [8, 128], strides = [1, 1]} : vector<8x384xf32> to vector<8x128xf32>
    %21 = vector.extract_strided_slice %19 {offsets = [0, 0], sizes = [8, 128], strides = [1, 1]} : vector<8x256xf32> to vector<8x128xf32>
    %22 = arith.addf %20, %21 : vector<8x128xf32>
    %23 = arith.negf %22 : vector<8x128xf32>
    %24 = math.exp %23 : vector<8x128xf32>
    %cst_18 = arith.constant 1.000000e+00 : f32
    %25 = vector.broadcast %cst_18 : f32 to vector<8x128xf32>
    %26 = arith.addf %25, %24 : vector<8x128xf32>
    %27 = arith.divf %25, %26 : vector<8x128xf32>
    %28 = vector.extract_strided_slice %16 {offsets = [0, 128], sizes = [8, 128], strides = [1, 1]} : vector<8x384xf32> to vector<8x128xf32>
    %29 = vector.extract_strided_slice %19 {offsets = [0, 128], sizes = [8, 128], strides = [1, 1]} : vector<8x256xf32> to vector<8x128xf32>
    %30 = arith.addf %28, %29 : vector<8x128xf32>
    %31 = arith.negf %30 : vector<8x128xf32>
    %32 = math.exp %31 : vector<8x128xf32>
    %cst_19 = arith.constant 1.000000e+00 : f32
    %33 = vector.broadcast %cst_19 : f32 to vector<8x128xf32>
    %34 = arith.addf %33, %32 : vector<8x128xf32>
    %35 = arith.divf %33, %34 : vector<8x128xf32>
    %36 = vector.extract_strided_slice %16 {offsets = [0, 256], sizes = [8, 128], strides = [1, 1]} : vector<8x384xf32> to vector<8x128xf32>
    %37 = arith.mulf %35, %13 : vector<8x128xf32>
    %38 = arith.truncf %37 : vector<8x128xf32> to vector<8x128xbf16>
    %c0_20 = arith.constant 0 : index
    %c0_21 = arith.constant 0 : index
    %39 = vector.load %arg5[%c0_20, %c0_21] : memref<128x128xbf16, #tpu.memory_space<vmem>>, vector<128x128xbf16>
    %cst_22 = arith.constant dense<0.000000e+00> : vector<8x128xf32>
    %40 = tpu.matmul %38, %39, %cst_22 {dimension_numbers = #tpu.dot_dimension_numbers<[1], [0], [0], [1], [0, 0, 1, 1], [], []>} : vector<8x128xbf16>, vector<128x128xbf16>, vector<8x128xf32> -> vector<8x128xf32>
    %41 = arith.addf %36, %40 : vector<8x128xf32>
    %42 = math.tanh %41 : vector<8x128xf32>
    %43 = arith.subf %42, %13 : vector<8x128xf32>
    %44 = arith.mulf %27, %43 : vector<8x128xf32>
    %45 = arith.addf %13, %44 : vector<8x128xf32>
    %46 = arith.index_cast %c0_i32_12 : i32 to index
    %c0_23 = arith.constant 0 : index
    %c0_24 = arith.constant 0 : index
    %47 = vector.load %arg9[%46, %c0_23, %c0_24] : memref<8x8x128xf32, #tpu.memory_space<vmem>>, vector<1x8x128xf32>
    %48 = vector.shape_cast %47 : vector<1x8x128xf32> to vector<8x128xf32>
    %49 = vector.shape_cast %45 : vector<8x128xf32> to vector<1x8x128xf32>
    tpu.vector_store %arg9[%46, %c0_23, %c0_24], %49 {strides = array<i32>} : memref<8x8x128xf32, #tpu.memory_space<vmem>>, vector<1x8x128xf32>,
    %c1_i32 = arith.constant 1 : i32
    %50 = arith.index_cast %c1_i32 : i32 to index
    %c0_25 = arith.constant 0 : index
    %c0_26 = arith.constant 0 : index
    %51 = vector.load %arg11[%50, %c0_25, %c0_26] : memref<8x8x384xf32, #tpu.memory_space<vmem>>, vector<1x8x384xf32>
    %52 = vector.shape_cast %51 : vector<1x8x384xf32> to vector<8x384xf32>
    %53 = arith.truncf %45 : vector<8x128xf32> to vector<8x128xbf16>
    %c0_27 = arith.constant 0 : index
    %c0_28 = arith.constant 0 : index
    %54 = vector.load %arg4[%c0_27, %c0_28] : memref<128x256xbf16, #tpu.memory_space<vmem>>, vector<128x256xbf16>
    %cst_29 = arith.constant dense<0.000000e+00> : vector<8x256xf32>
    %55 = tpu.matmul %53, %54, %cst_29 {dimension_numbers = #tpu.dot_dimension_numbers<[1], [0], [0], [1], [0, 0, 1, 1], [], []>} : vector<8x128xbf16>, vector<128x256xbf16>, vector<8x256xf32> -> vector<8x256xf32>
    %56 = vector.extract_strided_slice %52 {offsets = [0, 0], sizes = [8, 128], strides = [1, 1]} : vector<8x384xf32> to vector<8x128xf32>
    %57 = vector.extract_strided_slice %55 {offsets = [0, 0], sizes = [8, 128], strides = [1, 1]} : vector<8x256xf32> to vector<8x128xf32>
    %58 = arith.addf %56, %57 : vector<8x128xf32>
    %59 = arith.negf %58 : vector<8x128xf32>
    %60 = math.exp %59 : vector<8x128xf32>
    %cst_30 = arith.constant 1.000000e+00 : f32
    %61 = vector.broadcast %cst_30 : f32 to vector<8x128xf32>
    %62 = arith.addf %61, %60 : vector<8x128xf32>
    %63 = arith.divf %61, %62 : vector<8x128xf32>
    %64 = vector.extract_strided_slice %52 {offsets = [0, 128], sizes = [8, 128], strides = [1, 1]} : vector<8x384xf32> to vector<8x128xf32>
    %65 = vector.extract_strided_slice %55 {offsets = [0, 128], sizes = [8, 128], strides = [1, 1]} : vector<8x256xf32> to vector<8x128xf32>
    %66 = arith.addf %64, %65 : vector<8x128xf32>
    %67 = arith.negf %66 : vector<8x128xf32>
    %68 = math.exp %67 : vector<8x128xf32>
    %cst_31 = arith.constant 1.000000e+00 : f32
    %69 = vector.broadcast %cst_31 : f32 to vector<8x128xf32>
    %70 = arith.addf %69, %68 : vector<8x128xf32>
    %71 = arith.divf %69, %70 : vector<8x128xf32>
    %72 = vector.extract_strided_slice %52 {offsets = [0, 256], sizes = [8, 128], strides = [1, 1]} : vector<8x384xf32> to vector<8x128xf32>
    %73 = arith.mulf %71, %45 : vector<8x128xf32>
    %74 = arith.truncf %73 : vector<8x128xf32> to vector<8x128xbf16>
    %c0_32 = arith.constant 0 : index
    %c0_33 = arith.constant 0 : index
    %75 = vector.load %arg5[%c0_32, %c0_33] : memref<128x128xbf16, #tpu.memory_space<vmem>>, vector<128x128xbf16>
    %cst_34 = arith.constant dense<0.000000e+00> : vector<8x128xf32>
    %76 = tpu.matmul %74, %75, %cst_34 {dimension_numbers = #tpu.dot_dimension_numbers<[1], [0], [0], [1], [0, 0, 1, 1], [], []>} : vector<8x128xbf16>, vector<128x128xbf16>, vector<8x128xf32> -> vector<8x128xf32>
    %77 = arith.addf %72, %76 : vector<8x128xf32>
    %78 = math.tanh %77 : vector<8x128xf32>
    %79 = arith.subf %78, %45 : vector<8x128xf32>
    %80 = arith.mulf %63, %79 : vector<8x128xf32>
    %81 = arith.addf %45, %80 : vector<8x128xf32>
    %82 = arith.index_cast %c1_i32 : i32 to index
    %c0_35 = arith.constant 0 : index
    %c0_36 = arith.constant 0 : index
    %83 = vector.load %arg9[%82, %c0_35, %c0_36] : memref<8x8x128xf32, #tpu.memory_space<vmem>>, vector<1x8x128xf32>
    %84 = vector.shape_cast %83 : vector<1x8x128xf32> to vector<8x128xf32>
    %85 = vector.shape_cast %81 : vector<8x128xf32> to vector<1x8x128xf32>
    tpu.vector_store %arg9[%82, %c0_35, %c0_36], %85 {strides = array<i32>} : memref<8x8x128xf32, #tpu.memory_space<vmem>>, vector<1x8x128xf32>,
    %c2_i32 = arith.constant 2 : i32
    %86 = arith.index_cast %c2_i32 : i32 to index
    %c0_37 = arith.constant 0 : index
    %c0_38 = arith.constant 0 : index
    %87 = vector.load %arg11[%86, %c0_37, %c0_38] : memref<8x8x384xf32, #tpu.memory_space<vmem>>, vector<1x8x384xf32>
    %88 = vector.shape_cast %87 : vector<1x8x384xf32> to vector<8x384xf32>
    %89 = arith.truncf %81 : vector<8x128xf32> to vector<8x128xbf16>
    %c0_39 = arith.constant 0 : index
    %c0_40 = arith.constant 0 : index
    %90 = vector.load %arg4[%c0_39, %c0_40] : memref<128x256xbf16, #tpu.memory_space<vmem>>, vector<128x256xbf16>
    %cst_41 = arith.constant dense<0.000000e+00> : vector<8x256xf32>
    %91 = tpu.matmul %89, %90, %cst_41 {dimension_numbers = #tpu.dot_dimension_numbers<[1], [0], [0], [1], [0, 0, 1, 1], [], []>} : vector<8x128xbf16>, vector<128x256xbf16>, vector<8x256xf32> -> vector<8x256xf32>
    %92 = vector.extract_strided_slice %88 {offsets = [0, 0], sizes = [8, 128], strides = [1, 1]} : vector<8x384xf32> to vector<8x128xf32>
    %93 = vector.extract_strided_slice %91 {offsets = [0, 0], sizes = [8, 128], strides = [1, 1]} : vector<8x256xf32> to vector<8x128xf32>
    %94 = arith.addf %92, %93 : vector<8x128xf32>
    %95 = arith.negf %94 : vector<8x128xf32>
    %96 = math.exp %95 : vector<8x128xf32>
    %cst_42 = arith.constant 1.000000e+00 : f32
    %97 = vector.broadcast %cst_42 : f32 to vector<8x128xf32>
    %98 = arith.addf %97, %96 : vector<8x128xf32>
    %99 = arith.divf %97, %98 : vector<8x128xf32>
    %100 = vector.extract_strided_slice %88 {offsets = [0, 128], sizes = [8, 128], strides = [1, 1]} : vector<8x384xf32> to vector<8x128xf32>
    %101 = vector.extract_strided_slice %91 {offsets = [0, 128], sizes = [8, 128], strides = [1, 1]} : vector<8x256xf32> to vector<8x128xf32>
    %102 = arith.addf %100, %101 : vector<8x128xf32>
    %103 = arith.negf %102 : vector<8x128xf32>
    %104 = math.exp %103 : vector<8x128xf32>
    %cst_43 = arith.constant 1.000000e+00 : f32
    %105 = vector.broadcast %cst_43 : f32 to vector<8x128xf32>
    %106 = arith.addf %105, %104 : vector<8x128xf32>
    %107 = arith.divf %105, %106 : vector<8x128xf32>
    %108 = vector.extract_strided_slice %88 {offsets = [0, 256], sizes = [8, 128], strides = [1, 1]} : vector<8x384xf32> to vector<8x128xf32>
    %109 = arith.mulf %107, %81 : vector<8x128xf32>
    %110 = arith.truncf %109 : vector<8x128xf32> to vector<8x128xbf16>
    %c0_44 = arith.constant 0 : index
    %c0_45 = arith.constant 0 : index
    %111 = vector.load %arg5[%c0_44, %c0_45] : memref<128x128xbf16, #tpu.memory_space<vmem>>, vector<128x128xbf16>
    %cst_46 = arith.constant dense<0.000000e+00> : vector<8x128xf32>
    %112 = tpu.matmul %110, %111, %cst_46 {dimension_numbers = #tpu.dot_dimension_numbers<[1], [0], [0], [1], [0, 0, 1, 1], [], []>} : vector<8x128xbf16>, vector<128x128xbf16>, vector<8x128xf32> -> vector<8x128xf32>
    %113 = arith.addf %108, %112 : vector<8x128xf32>
    %114 = math.tanh %113 : vector<8x128xf32>
    %115 = arith.subf %114, %81 : vector<8x128xf32>
    %116 = arith.mulf %99, %115 : vector<8x128xf32>
    %117 = arith.addf %81, %116 : vector<8x128xf32>
    %118 = arith.index_cast %c2_i32 : i32 to index
    %c0_47 = arith.constant 0 : index
    %c0_48 = arith.constant 0 : index
    %119 = vector.load %arg9[%118, %c0_47, %c0_48] : memref<8x8x128xf32, #tpu.memory_space<vmem>>, vector<1x8x128xf32>
    %120 = vector.shape_cast %119 : vector<1x8x128xf32> to vector<8x128xf32>
    %121 = vector.shape_cast %117 : vector<8x128xf32> to vector<1x8x128xf32>
    tpu.vector_store %arg9[%118, %c0_47, %c0_48], %121 {strides = array<i32>} : memref<8x8x128xf32, #tpu.memory_space<vmem>>, vector<1x8x128xf32>,
    %c3_i32 = arith.constant 3 : i32
    %122 = arith.index_cast %c3_i32 : i32 to index
    %c0_49 = arith.constant 0 : index
    %c0_50 = arith.constant 0 : index
    %123 = vector.load %arg11[%122, %c0_49, %c0_50] : memref<8x8x384xf32, #tpu.memory_space<vmem>>, vector<1x8x384xf32>
    %124 = vector.shape_cast %123 : vector<1x8x384xf32> to vector<8x384xf32>
    %125 = arith.truncf %117 : vector<8x128xf32> to vector<8x128xbf16>
    %c0_51 = arith.constant 0 : index
    %c0_52 = arith.constant 0 : index
    %126 = vector.load %arg4[%c0_51, %c0_52] : memref<128x256xbf16, #tpu.memory_space<vmem>>, vector<128x256xbf16>
    %cst_53 = arith.constant dense<0.000000e+00> : vector<8x256xf32>
    %127 = tpu.matmul %125, %126, %cst_53 {dimension_numbers = #tpu.dot_dimension_numbers<[1], [0], [0], [1], [0, 0, 1, 1], [], []>} : vector<8x128xbf16>, vector<128x256xbf16>, vector<8x256xf32> -> vector<8x256xf32>
    %128 = vector.extract_strided_slice %124 {offsets = [0, 0], sizes = [8, 128], strides = [1, 1]} : vector<8x384xf32> to vector<8x128xf32>
    %129 = vector.extract_strided_slice %127 {offsets = [0, 0], sizes = [8, 128], strides = [1, 1]} : vector<8x256xf32> to vector<8x128xf32>
    %130 = arith.addf %128, %129 : vector<8x128xf32>
    %131 = arith.negf %130 : vector<8x128xf32>
    %132 = math.exp %131 : vector<8x128xf32>
    %cst_54 = arith.constant 1.000000e+00 : f32
    %133 = vector.broadcast %cst_54 : f32 to vector<8x128xf32>
    %134 = arith.addf %133, %132 : vector<8x128xf32>
    %135 = arith.divf %133, %134 : vector<8x128xf32>
    %136 = vector.extract_strided_slice %124 {offsets = [0, 128], sizes = [8, 128], strides = [1, 1]} : vector<8x384xf32> to vector<8x128xf32>
    %137 = vector.extract_strided_slice %127 {offsets = [0, 128], sizes = [8, 128], strides = [1, 1]} : vector<8x256xf32> to vector<8x128xf32>
    %138 = arith.addf %136, %137 : vector<8x128xf32>
    %139 = arith.negf %138 : vector<8x128xf32>
    %140 = math.exp %139 : vector<8x128xf32>
    %cst_55 = arith.constant 1.000000e+00 : f32
    %141 = vector.broadcast %cst_55 : f32 to vector<8x128xf32>
    %142 = arith.addf %141, %140 : vector<8x128xf32>
    %143 = arith.divf %141, %142 : vector<8x128xf32>
    %144 = vector.extract_strided_slice %124 {offsets = [0, 256], sizes = [8, 128], strides = [1, 1]} : vector<8x384xf32> to vector<8x128xf32>
    %145 = arith.mulf %143, %117 : vector<8x128xf32>
    %146 = arith.truncf %145 : vector<8x128xf32> to vector<8x128xbf16>
    %c0_56 = arith.constant 0 : index
    %c0_57 = arith.constant 0 : index
    %147 = vector.load %arg5[%c0_56, %c0_57] : memref<128x128xbf16, #tpu.memory_space<vmem>>, vector<128x128xbf16>
    %cst_58 = arith.constant dense<0.000000e+00> : vector<8x128xf32>
    %148 = tpu.matmul %146, %147, %cst_58 {dimension_numbers = #tpu.dot_dimension_numbers<[1], [0], [0], [1], [0, 0, 1, 1], [], []>} : vector<8x128xbf16>, vector<128x128xbf16>, vector<8x128xf32> -> vector<8x128xf32>
    %149 = arith.addf %144, %148 : vector<8x128xf32>
    %150 = math.tanh %149 : vector<8x128xf32>
    %151 = arith.subf %150, %117 : vector<8x128xf32>
    %152 = arith.mulf %135, %151 : vector<8x128xf32>
    %153 = arith.addf %117, %152 : vector<8x128xf32>
    %154 = arith.index_cast %c3_i32 : i32 to index
    %c0_59 = arith.constant 0 : index
    %c0_60 = arith.constant 0 : index
    %155 = vector.load %arg9[%154, %c0_59, %c0_60] : memref<8x8x128xf32, #tpu.memory_space<vmem>>, vector<1x8x128xf32>
    %156 = vector.shape_cast %155 : vector<1x8x128xf32> to vector<8x128xf32>
    %157 = vector.shape_cast %153 : vector<8x128xf32> to vector<1x8x128xf32>
    tpu.vector_store %arg9[%154, %c0_59, %c0_60], %157 {strides = array<i32>} : memref<8x8x128xf32, #tpu.memory_space<vmem>>, vector<1x8x128xf32>,
    %c4_i32 = arith.constant 4 : i32
    %158 = arith.index_cast %c4_i32 : i32 to index
    %c0_61 = arith.constant 0 : index
    %c0_62 = arith.constant 0 : index
    %159 = vector.load %arg11[%158, %c0_61, %c0_62] : memref<8x8x384xf32, #tpu.memory_space<vmem>>, vector<1x8x384xf32>
    %160 = vector.shape_cast %159 : vector<1x8x384xf32> to vector<8x384xf32>
    %161 = arith.truncf %153 : vector<8x128xf32> to vector<8x128xbf16>
    %c0_63 = arith.constant 0 : index
    %c0_64 = arith.constant 0 : index
    %162 = vector.load %arg4[%c0_63, %c0_64] : memref<128x256xbf16, #tpu.memory_space<vmem>>, vector<128x256xbf16>
    %cst_65 = arith.constant dense<0.000000e+00> : vector<8x256xf32>
    %163 = tpu.matmul %161, %162, %cst_65 {dimension_numbers = #tpu.dot_dimension_numbers<[1], [0], [0], [1], [0, 0, 1, 1], [], []>} : vector<8x128xbf16>, vector<128x256xbf16>, vector<8x256xf32> -> vector<8x256xf32>
    %164 = vector.extract_strided_slice %160 {offsets = [0, 0], sizes = [8, 128], strides = [1, 1]} : vector<8x384xf32> to vector<8x128xf32>
    %165 = vector.extract_strided_slice %163 {offsets = [0, 0], sizes = [8, 128], strides = [1, 1]} : vector<8x256xf32> to vector<8x128xf32>
    %166 = arith.addf %164, %165 : vector<8x128xf32>
    %167 = arith.negf %166 : vector<8x128xf32>
    %168 = math.exp %167 : vector<8x128xf32>
    %cst_66 = arith.constant 1.000000e+00 : f32
    %169 = vector.broadcast %cst_66 : f32 to vector<8x128xf32>
    %170 = arith.addf %169, %168 : vector<8x128xf32>
    %171 = arith.divf %169, %170 : vector<8x128xf32>
    %172 = vector.extract_strided_slice %160 {offsets = [0, 128], sizes = [8, 128], strides = [1, 1]} : vector<8x384xf32> to vector<8x128xf32>
    %173 = vector.extract_strided_slice %163 {offsets = [0, 128], sizes = [8, 128], strides = [1, 1]} : vector<8x256xf32> to vector<8x128xf32>
    %174 = arith.addf %172, %173 : vector<8x128xf32>
    %175 = arith.negf %174 : vector<8x128xf32>
    %176 = math.exp %175 : vector<8x128xf32>
    %cst_67 = arith.constant 1.000000e+00 : f32
    %177 = vector.broadcast %cst_67 : f32 to vector<8x128xf32>
    %178 = arith.addf %177, %176 : vector<8x128xf32>
    %179 = arith.divf %177, %178 : vector<8x128xf32>
    %180 = vector.extract_strided_slice %160 {offsets = [0, 256], sizes = [8, 128], strides = [1, 1]} : vector<8x384xf32> to vector<8x128xf32>
    %181 = arith.mulf %179, %153 : vector<8x128xf32>
    %182 = arith.truncf %181 : vector<8x128xf32> to vector<8x128xbf16>
    %c0_68 = arith.constant 0 : index
    %c0_69 = arith.constant 0 : index
    %183 = vector.load %arg5[%c0_68, %c0_69] : memref<128x128xbf16, #tpu.memory_space<vmem>>, vector<128x128xbf16>
    %cst_70 = arith.constant dense<0.000000e+00> : vector<8x128xf32>
    %184 = tpu.matmul %182, %183, %cst_70 {dimension_numbers = #tpu.dot_dimension_numbers<[1], [0], [0], [1], [0, 0, 1, 1], [], []>} : vector<8x128xbf16>, vector<128x128xbf16>, vector<8x128xf32> -> vector<8x128xf32>
    %185 = arith.addf %180, %184 : vector<8x128xf32>
    %186 = math.tanh %185 : vector<8x128xf32>
    %187 = arith.subf %186, %153 : vector<8x128xf32>
    %188 = arith.mulf %171, %187 : vector<8x128xf32>
    %189 = arith.addf %153, %188 : vector<8x128xf32>
    %190 = arith.index_cast %c4_i32 : i32 to index
    %c0_71 = arith.constant 0 : index
    %c0_72 = arith.constant 0 : index
    %191 = vector.load %arg9[%190, %c0_71, %c0_72] : memref<8x8x128xf32, #tpu.memory_space<vmem>>, vector<1x8x128xf32>
    %192 = vector.shape_cast %191 : vector<1x8x128xf32> to vector<8x128xf32>
    %193 = vector.shape_cast %189 : vector<8x128xf32> to vector<1x8x128xf32>
    tpu.vector_store %arg9[%190, %c0_71, %c0_72], %193 {strides = array<i32>} : memref<8x8x128xf32, #tpu.memory_space<vmem>>, vector<1x8x128xf32>,
    %c5_i32 = arith.constant 5 : i32
    %194 = arith.index_cast %c5_i32 : i32 to index
    %c0_73 = arith.constant 0 : index
    %c0_74 = arith.constant 0 : index
    %195 = vector.load %arg11[%194, %c0_73, %c0_74] : memref<8x8x384xf32, #tpu.memory_space<vmem>>, vector<1x8x384xf32>
    %196 = vector.shape_cast %195 : vector<1x8x384xf32> to vector<8x384xf32>
    %197 = arith.truncf %189 : vector<8x128xf32> to vector<8x128xbf16>
    %c0_75 = arith.constant 0 : index
    %c0_76 = arith.constant 0 : index
    %198 = vector.load %arg4[%c0_75, %c0_76] : memref<128x256xbf16, #tpu.memory_space<vmem>>, vector<128x256xbf16>
    %cst_77 = arith.constant dense<0.000000e+00> : vector<8x256xf32>
    %199 = tpu.matmul %197, %198, %cst_77 {dimension_numbers = #tpu.dot_dimension_numbers<[1], [0], [0], [1], [0, 0, 1, 1], [], []>} : vector<8x128xbf16>, vector<128x256xbf16>, vector<8x256xf32> -> vector<8x256xf32>
    %200 = vector.extract_strided_slice %196 {offsets = [0, 0], sizes = [8, 128], strides = [1, 1]} : vector<8x384xf32> to vector<8x128xf32>
    %201 = vector.extract_strided_slice %199 {offsets = [0, 0], sizes = [8, 128], strides = [1, 1]} : vector<8x256xf32> to vector<8x128xf32>
    %202 = arith.addf %200, %201 : vector<8x128xf32>
    %203 = arith.negf %202 : vector<8x128xf32>
    %204 = math.exp %203 : vector<8x128xf32>
    %cst_78 = arith.constant 1.000000e+00 : f32
    %205 = vector.broadcast %cst_78 : f32 to vector<8x128xf32>
    %206 = arith.addf %205, %204 : vector<8x128xf32>
    %207 = arith.divf %205, %206 : vector<8x128xf32>
    %208 = vector.extract_strided_slice %196 {offsets = [0, 128], sizes = [8, 128], strides = [1, 1]} : vector<8x384xf32> to vector<8x128xf32>
    %209 = vector.extract_strided_slice %199 {offsets = [0, 128], sizes = [8, 128], strides = [1, 1]} : vector<8x256xf32> to vector<8x128xf32>
    %210 = arith.addf %208, %209 : vector<8x128xf32>
    %211 = arith.negf %210 : vector<8x128xf32>
    %212 = math.exp %211 : vector<8x128xf32>
    %cst_79 = arith.constant 1.000000e+00 : f32
    %213 = vector.broadcast %cst_79 : f32 to vector<8x128xf32>
    %214 = arith.addf %213, %212 : vector<8x128xf32>
    %215 = arith.divf %213, %214 : vector<8x128xf32>
    %216 = vector.extract_strided_slice %196 {offsets = [0, 256], sizes = [8, 128], strides = [1, 1]} : vector<8x384xf32> to vector<8x128xf32>
    %217 = arith.mulf %215, %189 : vector<8x128xf32>
    %218 = arith.truncf %217 : vector<8x128xf32> to vector<8x128xbf16>
    %c0_80 = arith.constant 0 : index
    %c0_81 = arith.constant 0 : index
    %219 = vector.load %arg5[%c0_80, %c0_81] : memref<128x128xbf16, #tpu.memory_space<vmem>>, vector<128x128xbf16>
    %cst_82 = arith.constant dense<0.000000e+00> : vector<8x128xf32>
    %220 = tpu.matmul %218, %219, %cst_82 {dimension_numbers = #tpu.dot_dimension_numbers<[1], [0], [0], [1], [0, 0, 1, 1], [], []>} : vector<8x128xbf16>, vector<128x128xbf16>, vector<8x128xf32> -> vector<8x128xf32>
    %221 = arith.addf %216, %220 : vector<8x128xf32>
    %222 = math.tanh %221 : vector<8x128xf32>
    %223 = arith.subf %222, %189 : vector<8x128xf32>
    %224 = arith.mulf %207, %223 : vector<8x128xf32>
    %225 = arith.addf %189, %224 : vector<8x128xf32>
    %226 = arith.index_cast %c5_i32 : i32 to index
    %c0_83 = arith.constant 0 : index
    %c0_84 = arith.constant 0 : index
    %227 = vector.load %arg9[%226, %c0_83, %c0_84] : memref<8x8x128xf32, #tpu.memory_space<vmem>>, vector<1x8x128xf32>
    %228 = vector.shape_cast %227 : vector<1x8x128xf32> to vector<8x128xf32>
    %229 = vector.shape_cast %225 : vector<8x128xf32> to vector<1x8x128xf32>
    tpu.vector_store %arg9[%226, %c0_83, %c0_84], %229 {strides = array<i32>} : memref<8x8x128xf32, #tpu.memory_space<vmem>>, vector<1x8x128xf32>,
    %c6_i32 = arith.constant 6 : i32
    %230 = arith.index_cast %c6_i32 : i32 to index
    %c0_85 = arith.constant 0 : index
    %c0_86 = arith.constant 0 : index
    %231 = vector.load %arg11[%230, %c0_85, %c0_86] : memref<8x8x384xf32, #tpu.memory_space<vmem>>, vector<1x8x384xf32>
    %232 = vector.shape_cast %231 : vector<1x8x384xf32> to vector<8x384xf32>
    %233 = arith.truncf %225 : vector<8x128xf32> to vector<8x128xbf16>
    %c0_87 = arith.constant 0 : index
    %c0_88 = arith.constant 0 : index
    %234 = vector.load %arg4[%c0_87, %c0_88] : memref<128x256xbf16, #tpu.memory_space<vmem>>, vector<128x256xbf16>
    %cst_89 = arith.constant dense<0.000000e+00> : vector<8x256xf32>
    %235 = tpu.matmul %233, %234, %cst_89 {dimension_numbers = #tpu.dot_dimension_numbers<[1], [0], [0], [1], [0, 0, 1, 1], [], []>} : vector<8x128xbf16>, vector<128x256xbf16>, vector<8x256xf32> -> vector<8x256xf32>
    %236 = vector.extract_strided_slice %232 {offsets = [0, 0], sizes = [8, 128], strides = [1, 1]} : vector<8x384xf32> to vector<8x128xf32>
    %237 = vector.extract_strided_slice %235 {offsets = [0, 0], sizes = [8, 128], strides = [1, 1]} : vector<8x256xf32> to vector<8x128xf32>
    %238 = arith.addf %236, %237 : vector<8x128xf32>
    %239 = arith.negf %238 : vector<8x128xf32>
    %240 = math.exp %239 : vector<8x128xf32>
    %cst_90 = arith.constant 1.000000e+00 : f32
    %241 = vector.broadcast %cst_90 : f32 to vector<8x128xf32>
    %242 = arith.addf %241, %240 : vector<8x128xf32>
    %243 = arith.divf %241, %242 : vector<8x128xf32>
    %244 = vector.extract_strided_slice %232 {offsets = [0, 128], sizes = [8, 128], strides = [1, 1]} : vector<8x384xf32> to vector<8x128xf32>
    %245 = vector.extract_strided_slice %235 {offsets = [0, 128], sizes = [8, 128], strides = [1, 1]} : vector<8x256xf32> to vector<8x128xf32>
    %246 = arith.addf %244, %245 : vector<8x128xf32>
    %247 = arith.negf %246 : vector<8x128xf32>
    %248 = math.exp %247 : vector<8x128xf32>
    %cst_91 = arith.constant 1.000000e+00 : f32
    %249 = vector.broadcast %cst_91 : f32 to vector<8x128xf32>
    %250 = arith.addf %249, %248 : vector<8x128xf32>
    %251 = arith.divf %249, %250 : vector<8x128xf32>
    %252 = vector.extract_strided_slice %232 {offsets = [0, 256], sizes = [8, 128], strides = [1, 1]} : vector<8x384xf32> to vector<8x128xf32>
    %253 = arith.mulf %251, %225 : vector<8x128xf32>
    %254 = arith.truncf %253 : vector<8x128xf32> to vector<8x128xbf16>
    %c0_92 = arith.constant 0 : index
    %c0_93 = arith.constant 0 : index
    %255 = vector.load %arg5[%c0_92, %c0_93] : memref<128x128xbf16, #tpu.memory_space<vmem>>, vector<128x128xbf16>
    %cst_94 = arith.constant dense<0.000000e+00> : vector<8x128xf32>
    %256 = tpu.matmul %254, %255, %cst_94 {dimension_numbers = #tpu.dot_dimension_numbers<[1], [0], [0], [1], [0, 0, 1, 1], [], []>} : vector<8x128xbf16>, vector<128x128xbf16>, vector<8x128xf32> -> vector<8x128xf32>
    %257 = arith.addf %252, %256 : vector<8x128xf32>
    %258 = math.tanh %257 : vector<8x128xf32>
    %259 = arith.subf %258, %225 : vector<8x128xf32>
    %260 = arith.mulf %243, %259 : vector<8x128xf32>
    %261 = arith.addf %225, %260 : vector<8x128xf32>
    %262 = arith.index_cast %c6_i32 : i32 to index
    %c0_95 = arith.constant 0 : index
    %c0_96 = arith.constant 0 : index
    %263 = vector.load %arg9[%262, %c0_95, %c0_96] : memref<8x8x128xf32, #tpu.memory_space<vmem>>, vector<1x8x128xf32>
    %264 = vector.shape_cast %263 : vector<1x8x128xf32> to vector<8x128xf32>
    %265 = vector.shape_cast %261 : vector<8x128xf32> to vector<1x8x128xf32>
    tpu.vector_store %arg9[%262, %c0_95, %c0_96], %265 {strides = array<i32>} : memref<8x8x128xf32, #tpu.memory_space<vmem>>, vector<1x8x128xf32>,
    %c7_i32 = arith.constant 7 : i32
    %266 = arith.index_cast %c7_i32 : i32 to index
    %c0_97 = arith.constant 0 : index
    %c0_98 = arith.constant 0 : index
    %267 = vector.load %arg11[%266, %c0_97, %c0_98] : memref<8x8x384xf32, #tpu.memory_space<vmem>>, vector<1x8x384xf32>
    %268 = vector.shape_cast %267 : vector<1x8x384xf32> to vector<8x384xf32>
    %269 = arith.truncf %261 : vector<8x128xf32> to vector<8x128xbf16>
    %c0_99 = arith.constant 0 : index
    %c0_100 = arith.constant 0 : index
    %270 = vector.load %arg4[%c0_99, %c0_100] : memref<128x256xbf16, #tpu.memory_space<vmem>>, vector<128x256xbf16>
    %cst_101 = arith.constant dense<0.000000e+00> : vector<8x256xf32>
    %271 = tpu.matmul %269, %270, %cst_101 {dimension_numbers = #tpu.dot_dimension_numbers<[1], [0], [0], [1], [0, 0, 1, 1], [], []>} : vector<8x128xbf16>, vector<128x256xbf16>, vector<8x256xf32> -> vector<8x256xf32>
    %272 = vector.extract_strided_slice %268 {offsets = [0, 0], sizes = [8, 128], strides = [1, 1]} : vector<8x384xf32> to vector<8x128xf32>
    %273 = vector.extract_strided_slice %271 {offsets = [0, 0], sizes = [8, 128], strides = [1, 1]} : vector<8x256xf32> to vector<8x128xf32>
    %274 = arith.addf %272, %273 : vector<8x128xf32>
    %275 = arith.negf %274 : vector<8x128xf32>
    %276 = math.exp %275 : vector<8x128xf32>
    %cst_102 = arith.constant 1.000000e+00 : f32
    %277 = vector.broadcast %cst_102 : f32 to vector<8x128xf32>
    %278 = arith.addf %277, %276 : vector<8x128xf32>
    %279 = arith.divf %277, %278 : vector<8x128xf32>
    %280 = vector.extract_strided_slice %268 {offsets = [0, 128], sizes = [8, 128], strides = [1, 1]} : vector<8x384xf32> to vector<8x128xf32>
    %281 = vector.extract_strided_slice %271 {offsets = [0, 128], sizes = [8, 128], strides = [1, 1]} : vector<8x256xf32> to vector<8x128xf32>
    %282 = arith.addf %280, %281 : vector<8x128xf32>
    %283 = arith.negf %282 : vector<8x128xf32>
    %284 = math.exp %283 : vector<8x128xf32>
    %cst_103 = arith.constant 1.000000e+00 : f32
    %285 = vector.broadcast %cst_103 : f32 to vector<8x128xf32>
    %286 = arith.addf %285, %284 : vector<8x128xf32>
    %287 = arith.divf %285, %286 : vector<8x128xf32>
    %288 = vector.extract_strided_slice %268 {offsets = [0, 256], sizes = [8, 128], strides = [1, 1]} : vector<8x384xf32> to vector<8x128xf32>
    %289 = arith.mulf %287, %261 : vector<8x128xf32>
    %290 = arith.truncf %289 : vector<8x128xf32> to vector<8x128xbf16>
    %c0_104 = arith.constant 0 : index
    %c0_105 = arith.constant 0 : index
    %291 = vector.load %arg5[%c0_104, %c0_105] : memref<128x128xbf16, #tpu.memory_space<vmem>>, vector<128x128xbf16>
    %cst_106 = arith.constant dense<0.000000e+00> : vector<8x128xf32>
    %292 = tpu.matmul %290, %291, %cst_106 {dimension_numbers = #tpu.dot_dimension_numbers<[1], [0], [0], [1], [0, 0, 1, 1], [], []>} : vector<8x128xbf16>, vector<128x128xbf16>, vector<8x128xf32> -> vector<8x128xf32>
    %293 = arith.addf %288, %292 : vector<8x128xf32>
    %294 = math.tanh %293 : vector<8x128xf32>
    %295 = arith.subf %294, %261 : vector<8x128xf32>
    %296 = arith.mulf %279, %295 : vector<8x128xf32>
    %297 = arith.addf %261, %296 : vector<8x128xf32>
    %298 = arith.index_cast %c7_i32 : i32 to index
    %c0_107 = arith.constant 0 : index
    %c0_108 = arith.constant 0 : index
    %299 = vector.load %arg9[%298, %c0_107, %c0_108] : memref<8x8x128xf32, #tpu.memory_space<vmem>>, vector<1x8x128xf32>
    %300 = vector.shape_cast %299 : vector<1x8x128xf32> to vector<8x128xf32>
    %301 = vector.shape_cast %297 : vector<8x128xf32> to vector<1x8x128xf32>
    tpu.vector_store %arg9[%298, %c0_107, %c0_108], %301 {strides = array<i32>} : memref<8x8x128xf32, #tpu.memory_space<vmem>>, vector<1x8x128xf32>,
    %c8_i32 = arith.constant 8 : i32
    %c0_109 = arith.constant 0 : index
    %c0_110 = arith.constant 0 : index
    %302 = vector.load %arg10[%c0_109, %c0_110] : memref<8x128xf32, #tpu.memory_space<vmem>>, vector<8x128xf32>
    tpu.vector_store %arg10[%c0_109, %c0_110], %297 {strides = array<i32>} : memref<8x128xf32, #tpu.memory_space<vmem>>, vector<8x128xf32>,
    %c0_111 = arith.constant 0 : index
    %c0_112 = arith.constant 0 : index
    %c0_113 = arith.constant 0 : index
    %303 = vector.load %arg9[%c0_111, %c0_112, %c0_113] : memref<8x8x128xf32, #tpu.memory_space<vmem>>, vector<8x8x128xf32>
    %304 = vector.shape_cast %303 : vector<8x8x128xf32> to vector<64x128xf32>
    %305 = arith.truncf %304 : vector<64x128xf32> to vector<64x128xbf16>
    %c0_114 = arith.constant 0 : index
    %c0_115 = arith.constant 0 : index
    %306 = vector.load %arg6[%c0_114, %c0_115] : memref<128x128xbf16, #tpu.memory_space<vmem>>, vector<128x128xbf16>
    %cst_116 = arith.constant dense<0.000000e+00> : vector<64x128xf32>
    %307 = tpu.matmul %305, %306, %cst_116 {dimension_numbers = #tpu.dot_dimension_numbers<[1], [0], [0], [1], [0, 0, 1, 1], [], []>} : vector<64x128xbf16>, vector<128x128xbf16>, vector<64x128xf32> -> vector<64x128xf32>
    %c0_117 = arith.constant 0 : index
    %c0_118 = arith.constant 0 : index
    %308 = vector.load %arg7[%c0_117, %c0_118] : memref<1x128xf32, #tpu.memory_space<vmem>>, vector<1x128xf32>
    %309 = vector.broadcast %308 : vector<1x128xf32> to vector<64x128xf32>
    %310 = arith.addf %307, %309 : vector<64x128xf32>
    %311 = vector.shape_cast %310 : vector<64x128xf32> to vector<8x8x128xf32>
    %c0_119 = arith.constant 0 : index
    %c0_120 = arith.constant 0 : index
    %c0_121 = arith.constant 0 : index
    %312 = vector.load %arg8[%c0_119, %c0_120, %c0_121] : memref<8x8x128xf32, #tpu.memory_space<vmem>>, vector<8x8x128xf32>
    tpu.vector_store %arg8[%c0_119, %c0_120, %c0_121], %311 {strides = array<i32>} : memref<8x8x128xf32, #tpu.memory_space<vmem>>, vector<8x8x128xf32>,
    return
  }
  func.func @transform_0(%arg0: i32) -> (i32, i32, i32) {
    %c0_i32 = arith.constant 0 : i32
    %c0_i32_0 = arith.constant 0 : i32
    %c0_i32_1 = arith.constant 0 : i32
    return %arg0, %c0_i32, %c0_i32_0 : i32, i32, i32
  }
  func.func @transform_1(%arg0: i32) -> (i32, i32) {
    %c0_i32 = arith.constant 0 : i32
    %c0_i32_0 = arith.constant 0 : i32
    %c0_i32_1 = arith.constant 0 : i32
    return %c0_i32, %c0_i32_0 : i32, i32
  }
  func.func @transform_2(%arg0: i32) -> (i32, i32) {
    %c0_i32 = arith.constant 0 : i32
    %c0_i32_0 = arith.constant 0 : i32
    %c0_i32_1 = arith.constant 0 : i32
    return %c0_i32, %c0_i32_0 : i32, i32
  }
  func.func @transform_3(%arg0: i32) -> (i32, i32) {
    %c0_i32 = arith.constant 0 : i32
    %c0_i32_0 = arith.constant 0 : i32
    %c0_i32_1 = arith.constant 0 : i32
    return %c0_i32, %c0_i32_0 : i32, i32
  }
  func.func @transform_4(%arg0: i32) -> (i32, i32) {
    %c0_i32 = arith.constant 0 : i32
    %c0_i32_0 = arith.constant 0 : i32
    %c0_i32_1 = arith.constant 0 : i32
    return %c0_i32, %c0_i32_0 : i32, i32
  }
  func.func @transform_5(%arg0: i32) -> (i32, i32) {
    %c0_i32 = arith.constant 0 : i32
    %c0_i32_0 = arith.constant 0 : i32
    %c0_i32_1 = arith.constant 0 : i32
    return %c0_i32, %c0_i32_0 : i32, i32
  }
  func.func @transform_6(%arg0: i32) -> (i32, i32) {
    %c0_i32 = arith.constant 0 : i32
    %c0_i32_0 = arith.constant 0 : i32
    %c0_i32_1 = arith.constant 0 : i32
    return %c0_i32, %c0_i32_0 : i32, i32
  }
  func.func @transform_7(%arg0: i32) -> (i32, i32, i32) {
    %c0_i32 = arith.constant 0 : i32
    %c0_i32_0 = arith.constant 0 : i32
    %c0_i32_1 = arith.constant 0 : i32
    return %arg0, %c0_i32, %c0_i32_0 : i32, i32, i32
  }
  func.func @transform_8(%arg0: i32) -> (i32, i32, i32) {
    %c0_i32 = arith.constant 0 : i32
    %c0_i32_0 = arith.constant 0 : i32
    %c0_i32_1 = arith.constant 0 : i32
    return %arg0, %c0_i32, %c0_i32_0 : i32, i32, i32
  }
}

</mosaic_0001>

<bundles_post_ra>
// kernel: tpu_custom_call.1
= control target key start
LH: loop header
LB: loop body
LE: loop exit
PB: predicated region body
PF: predicated region fallthrough
CT: control target
= control target key end

     0   :  { %14 = vsyncpa [#allocation5], 0  ;;  %s4333_s0 = inlined_call_operand.hbm [shape: f32[8,8,128], index: 0, kind: input, shape index: {}]   ;;  %s4334_s1 = inlined_call_operand.hbm [shape: bf16[128,384], index: 1, kind: input, shape index: {}]   ;;  %s4335_s2 = inlined_call_operand.vmem [shape: f32[1,384], index: 2, kind: input, shape index: {}]   ;;  %s4336_s3 = inlined_call_operand.hbm [shape: bf16[128,256], index: 3, kind: input, shape index: {}]   ;;  %s4337_s4 = inlined_call_operand.hbm [shape: bf16[128,128], index: 4, kind: input, shape index: {}]   ;;  %s4338_s5 = inlined_call_operand.hbm [shape: bf16[128,128], index: 5, kind: input, shape index: {}]   ;;  %s4339_s6 = inlined_call_operand.vmem [shape: f32[1,128], index: 6, kind: input, shape index: {}]   ;;  %s4340_s7 = inlined_call_operand.hbm [shape: f32[8,8,128], index: 7, kind: output, shape index: {0}]   ;;  %s4341_s8 = inlined_call_operand.hbm [shape: f32[8,8,128], index: 8, kind: output, shape index: {1}]  }
   0x1   :  { %15 = vsyncpa [#allocation8], 0 }
   0x2   :  { %16 = vsyncpa [#allocation11], 0 }
   0x3   :  { %17 = vsyncpa [#allocation6], 0 }
   0x4   :  { %18 = vsyncpa [#allocation15], 0  ;;  %s3763_s27 = smov [#allocation7]   ;;  %s3599_s9 = scalar_lea.hbm %s4334_s1, 3072 }
   0x5   :  { %s36_s28 = sshll.u32 %s3763_s27, 4  ;;  %p3600_p0 = scmp.ne.s32.totalorder %s4334_s1, %s3599_s9  ;;  %s37_s28 = int_to_ptr.vmem [resolvable:$true] %s36_s28 }
   0x6   :  { %p3603_p1 = scmp.lt.u32.totalorder %s3599_s9, %s4334_s1 }
   0x8   :  { %p3605_p2 = pnand %p3603_p1, %p3600_p0 }
   0xa   :  { %3608 = shalt.err (!%p3605_p2)
}
   0xb   :  { %s3609_s14 = scalar_lea.vmem %s37_s28, 3072  ;;  %p3614_p4 = scmp.lt.s32.totalorder %s37_s28, %s37_s28 }
   0xc   :  { %p3610_p3 = scmp.ne.s32.totalorder %s37_s28, %s3609_s14  ;;  %p3615_p5 = scmp.lt.s32.totalorder %s3609_s14, %s3609_s14 }
   0xe   :  { %p3616_p6 = por %p3615_p5, %p3614_p4 }
  0x10   :  { %p3617_p7 = pnand %p3616_p6, %p3610_p3 }
  0x12   :  { %3620 = shalt.err (!%p3617_p7)
}
  0x13   :  { %s3764_s15 = smov 192   ;;  %s3765_s16 = smov 12  }
  0x14   :  { %42 = dma.hbm_to_vmem [thread:$0]  %s4334_s1, 3072, %s37_s28, [#allocation8], %s3764_s15, %s3764_s15, %s3765_s16  }
  0x15   :  { %s3766_s19 = smov [#allocation10]   ;;  %s3621_s23 = scalar_lea.hbm %s4337_s4, 1024 }
  0x16   :  { %s62_s20 = sshll.u32 %s3766_s19, 4  ;;  %p3622_p8 = scmp.ne.s32.totalorder %s4337_s4, %s3621_s23  ;;  %s63_s20 = int_to_ptr.vmem [resolvable:$true] %s62_s20 }
  0x17   :  { %p3625_p9 = scmp.lt.u32.totalorder %s3621_s23, %s4337_s4 }
  0x19   :  { %p3627_p10 = pnand %p3625_p9, %p3622_p8 }
  0x1b   :  { %3630 = shalt.err (!%p3627_p10)
}
  0x1c   :  { %s3631_s29 = scalar_lea.vmem %s63_s20, 1024  ;;  %p3636_p12 = scmp.lt.s32.totalorder %s63_s20, %s63_s20 }
  0x1d   :  { %p3632_p11 = scmp.ne.s32.totalorder %s63_s20, %s3631_s29  ;;  %p3637_p13 = scmp.lt.s32.totalorder %s3631_s29, %s3631_s29 }
  0x1f   :  { %p3638_p0 = por %p3637_p13, %p3636_p12 }
  0x21   :  { %p3639_p1 = pnand %p3638_p0, %p3632_p11 }
  0x23   :  { %3642 = shalt.err (!%p3639_p1)
}
  0x24   :  { %s3767_s1 = smov 64   ;;  %s3768_s28 = smov 4  }
  0x25   :  { %68 = dma.hbm_to_vmem [thread:$0]  %s4337_s4, 1024, %s63_s20, [#allocation11], %s3767_s1, %s3767_s1, %s3768_s28  }
  0x26   :  { %s3769_s10 = smov [#allocation4]   ;;  %s3643_s14 = scalar_lea.hbm %s4333_s0, 1024 }
  0x27   :  { %s24_s11 = sshll.u32 %s3769_s10, 4  ;;  %p3644_p2 = scmp.ne.s32.totalorder %s4333_s0, %s3643_s14  ;;  %s25_s11 = int_to_ptr.vmem [resolvable:$true] %s24_s11 }
  0x28   :  { %p3647_p3 = scmp.lt.u32.totalorder %s3643_s14, %s4333_s0 }
  0x2a   :  { %p3649_p4 = pnand %p3647_p3, %p3644_p2 }
  0x2c   :  { %3652 = shalt.err (!%p3649_p4)
}
  0x2d   :  { %s3653_s19 = scalar_lea.vmem %s25_s11, 1024  ;;  %p3658_p6 = scmp.lt.s32.totalorder %s25_s11, %s25_s11 }
  0x2e   :  { %p3654_p5 = scmp.ne.s32.totalorder %s25_s11, %s3653_s19  ;;  %p3659_p7 = scmp.lt.s32.totalorder %s3653_s19, %s3653_s19 }
  0x30   :  { %p3660_p8 = por %p3659_p7, %p3658_p6 }
  0x32   :  { %p3661_p9 = pnand %p3660_p8, %p3654_p5 }
  0x34   :  { %3664 = shalt.err (!%p3661_p9)
}
  0x35   :  { %s3770_s4 = smov 128   ;;  %s3771_s20 = smov 8  }
  0x36   :  { %30 = dma.hbm_to_vmem [thread:$0]  %s4333_s0, 1024, %s25_s11, [#allocation5], %s3770_s4, %s3770_s4, %s3771_s20  }
  0x37   :  { %s3772_s23 = smov [#allocation9]   ;;  %s3773_s25 = smov [#allocation12]  }
  0x38   :  { %s50_s24 = sshll.u32 %s3772_s23, 4  ;;  %s74_s26 = sshll.u32 %s3773_s25, 4  ;;  %s51_s24 = int_to_ptr.vmem [resolvable:$true] %s50_s24  ;;  %s75_s26 = int_to_ptr.vmem [resolvable:$true] %s74_s26 }
  0x39   :  { %s3665_s30 = scalar_lea.hbm %s4336_s3, 2048 }
  0x3a   :  { %p3666_p10 = scmp.ne.s32.totalorder %s4336_s3, %s3665_s30  ;;  %p3669_p11 = scmp.lt.u32.totalorder %s3665_s30, %s4336_s3 }
  0x3c   :  { %p3671_p12 = pnand %p3669_p11, %p3666_p10 }
  0x3e   :  { %3674 = shalt.err (!%p3671_p12)
}
  0x3f   :  { %s3675_s0 = scalar_lea.vmem %s51_s24, 2048  ;;  %p3680_p0 = scmp.lt.s32.totalorder %s51_s24, %s51_s24 }
  0x40   :  { %p3676_p13 = scmp.ne.s32.totalorder %s51_s24, %s3675_s0  ;;  %p3681_p1 = scmp.lt.s32.totalorder %s3675_s0, %s3675_s0 }
  0x42   :  { %p3682_p2 = por %p3681_p1, %p3680_p0 }
  0x44   :  { %p3683_p3 = pnand %p3682_p2, %p3676_p13 }
  0x46   :  { %3686 = shalt.err (!%p3683_p3)
}
  0x47   :  { %56 = dma.hbm_to_vmem [thread:$0]  %s4336_s3, 2048, %s51_s24, [#allocation8], %s3770_s4, %s3770_s4, %s3771_s20  }
  0x48   :  { %s3687_s17 = scalar_lea.hbm %s4338_s5, 1024 }
  0x49   :  { %p3688_p4 = scmp.ne.s32.totalorder %s4338_s5, %s3687_s17  ;;  %p3691_p5 = scmp.lt.u32.totalorder %s3687_s17, %s4338_s5 }
  0x4b   :  { %p3693_p6 = pnand %p3691_p5, %p3688_p4 }
  0x4d   :  { %3696 = shalt.err (!%p3693_p6)
}
  0x4e   :  { %s3697_s23 = scalar_lea.vmem %s75_s26, 1024  ;;  %p3702_p8 = scmp.lt.s32.totalorder %s75_s26, %s75_s26 }
  0x4f   :  { %p3698_p7 = scmp.ne.s32.totalorder %s75_s26, %s3697_s23  ;;  %p3703_p9 = scmp.lt.s32.totalorder %s3697_s23, %s3697_s23 }
  0x51   :  { %p3704_p10 = por %p3703_p9, %p3702_p8 }
  0x53   :  { %p3705_p11 = pnand %p3704_p10, %p3698_p7 }
  0x55   :  { %3708 = shalt.err (!%p3705_p11)
}
  0x56   :  { %80 = dma.hbm_to_vmem [thread:$0]  %s4338_s5, 1024, %s75_s26, [#allocation11], %s3767_s1, %s3767_s1, %s3768_s28  }
  0x57   :  { %3753 = dma.done.wait [#allocation5], 1024  }
  0x58   :  { %3754 = vsyncadd [#allocation5], 4294966272 }
  0x59   :  { %3755 = dma.done.wait [#allocation8], 5120  }
  0x5a   :  { %3756 = vsyncadd [#allocation8], 4294962176 }
  0x5b   :  { %3757 = dma.done.wait [#allocation11], 2048  }
  0x5c   :  { %3758 = vsyncadd [#allocation11], 4294965248  ;;  %v3774_v0 = vmov 0   ;;  %v3360_v1 = vld [vmem:[#allocation7 + $0x4] ss:$12 sps:$4 sm:$0xff]   ;;  %v105_v34 = vld [vmem:[#allocation4 + $0x8] sm:$0xff]  ;;  %v150_v63 = vlaneseq }
  0x5d   :  { %325 = vmatprep.mubr.bf16.mxu1 %v3774_v0  ;;  %588 = vmatprep.mubr.bf16.mxu0 %v3774_v0  ;;  %v3899_v2 = vld [vmem:[#allocation9 + $0x4] ss:$8 sps:$4 sm:$0xff]   ;;  %v3901_v4 = vld [vmem:[#allocation9] ss:$8 sps:$4 sm:$0xff]   ;;  %v3905_v6 = vld [vmem:[#allocation9 + $0x14] ss:$8 sps:$4 sm:$0xff]  }
  0x5e   :  { %293 = vmatprep.subr.bf16.mxu1 %v3360_v1  ;;  %v3364_v3 = vld [vmem:[#allocation7] ss:$12 sps:$4 sm:$0xff]   ;;  %556 = vmatprep.subr.bf16.mxu0 %v3899_v2  ;;  %v3366_v5 = vld [vmem:[#allocation7 + $0x1c] ss:$12 sps:$4 sm:$0xff]   ;;  %v3370_v7 = vld [vmem:[#allocation7 + $0x18] ss:$12 sps:$4 sm:$0xff]  }
  0x5f   :  { %294 = vmatpush1.bf16.msra.mxu1 %v3364_v3  ;;  %557 = vmatpush1.bf16.msra.mxu0 %v3901_v4  ;;  %v3907_v8 = vld [vmem:[#allocation9 + $0x10] ss:$8 sps:$4 sm:$0xff]   ;;  %v3372_v9 = vld [vmem:[#allocation7 + $0x34] ss:$12 sps:$4 sm:$0xff]   ;;  %v3910_v10 = vld [vmem:[#allocation9 + $0x24] ss:$8 sps:$4 sm:$0xff]  }
  0x60   :  { %295 = vmatprep.subr.bf16.mxu1 %v3366_v5  ;;  %558 = vmatprep.subr.bf16.mxu0 %v3905_v6  ;;  %v3376_v11 = vld [vmem:[#allocation7 + $0x30] ss:$12 sps:$4 sm:$0xff]   ;;  %v3912_v12 = vld [vmem:[#allocation9 + $0x20] ss:$8 sps:$4 sm:$0xff]   ;;  %v3378_v13 = vld [vmem:[#allocation7 + $0x4c] ss:$12 sps:$4 sm:$0xff]  }
  0x61   :  { %v3916_v14 = vld [vmem:[#allocation9 + $0x34] ss:$8 sps:$4 sm:$0xff]   ;;  %v3919_v16 = vld [vmem:[#allocation9 + $0x30] ss:$8 sps:$4 sm:$0xff]   ;;  %v3922_v18 = vld [vmem:[#allocation9 + $0x44] ss:$8 sps:$4 sm:$0xff]  }
  0x62   :  { %v3382_v15 = vld [vmem:[#allocation7 + $0x48] ss:$12 sps:$4 sm:$0xff]   ;;  %v3384_v17 = vld [vmem:[#allocation7 + $0x64] ss:$12 sps:$4 sm:$0xff]   ;;  %v3388_v19 = vld [vmem:[#allocation7 + $0x60] ss:$12 sps:$4 sm:$0xff]  }
  0x63   :  { %296 = vmatpush1.bf16.msra.mxu1 %v3370_v7  ;;  %559 = vmatpush1.bf16.msra.mxu0 %v3907_v8  ;;  %v3924_v20 = vld [vmem:[#allocation9 + $0x40] ss:$8 sps:$4 sm:$0xff]   ;;  %v3928_v22 = vld [vmem:[#allocation9 + $0x54] ss:$8 sps:$4 sm:$0xff]   ;;  %v3394_v23 = vld [vmem:[#allocation7 + $0x78] ss:$12 sps:$4 sm:$0xff]  }
  0x64   :  { %297 = vmatprep.subr.bf16.mxu1 %v3372_v9  ;;  %560 = vmatprep.subr.bf16.mxu0 %v3910_v10  ;;  %v3390_v21 = vld [vmem:[#allocation7 + $0x7c] ss:$12 sps:$4 sm:$0xff]   ;;  %v3931_v24 = vld [vmem:[#allocation9 + $0x50] ss:$8 sps:$4 sm:$0xff]   ;;  %v3396_v25 = vld [vmem:[#allocation7 + $0x94] ss:$12 sps:$4 sm:$0xff]  }
  0x65   :  { %v3934_v26 = vld [vmem:[#allocation9 + $0x64] ss:$8 sps:$4 sm:$0xff]   ;;  %v3400_v27 = vld [vmem:[#allocation7 + $0x90] ss:$12 sps:$4 sm:$0xff]   ;;  %v3937_v28 = vld [vmem:[#allocation9 + $0x60] ss:$8 sps:$4 sm:$0xff]  }
  0x66   :  { %v3402_v29 = vld [vmem:[#allocation7 + $0xac] ss:$12 sps:$4 sm:$0xff]   ;;  %v3940_v30 = vld [vmem:[#allocation9 + $0x74] ss:$8 sps:$4 sm:$0xff]   ;;  %v104_v33 = vld [vmem:[#allocation4] sm:$0xff]  ;;  %v3775_v40 = vmov 0.0|0.0  }
  0x67   :  { %298 = vmatpush1.bf16.msra.mxu1 %v3376_v11  ;;  %561 = vmatpush1.bf16.msra.mxu0 %v3912_v12  ;;  %v3406_v31 = vld [vmem:[#allocation7 + $0xa8] ss:$12 sps:$4 sm:$0xff]   ;;  %v3942_v32 = vld [vmem:[#allocation9 + $0x70] ss:$8 sps:$4 sm:$0xff]   ;;  %v112_v36 = vpack.c.bf16 %v105_v34, %v104_v33  ;;  %v3409_v37 = vld [vmem:[#allocation7 + $0x20] ss:$12 sps:$4 sm:$0xff]  }
  0x68   :  { %299 = vmatprep.subr.bf16.mxu1 %v3378_v13  ;;  %562 = vmatprep.subr.bf16.mxu0 %v3916_v14  ;;  %v3408_v35 = vld [vmem:[#allocation7 + $0x8] ss:$12 sps:$4 sm:$0xff]   ;;  %v107_v39 = vld [vmem:[#allocation4 + $0x18] sm:$0xff]  ;;  %v108_v44 = vld [vmem:[#allocation4 + $0x20] sm:$0xff]  ;;  %v3776_v55 = vmov 0.0   ;;  %vm3777_vm0 = vmmov 0  }
  0x69   :  { %v106_v38 = vld [vmem:[#allocation4 + $0x10] sm:$0xff]  ;;  %v3410_v41 = vld [vmem:[#allocation7 + $0x38] ss:$12 sps:$4 sm:$0xff]   ;;  %v109_v45 = vld [vmem:[#allocation4 + $0x28] sm:$0xff]  ;;  %v151_v1 = vshrl.u32 %v150_v63, 7 }
  0x6a   :  { %v113_v42 = vpack.c.bf16 %v107_v39, %v106_v38  ;;  %v3411_v43 = vld [vmem:[#allocation7 + $0x50] ss:$12 sps:$4 sm:$0xff]   ;;  %v3412_v46 = vld [vmem:[#allocation7 + $0x68] ss:$12 sps:$4 sm:$0xff]   ;;  %v114_v47 = vpack.c.bf16 %v109_v45, %v108_v44  ;;  %v3413_v48 = vld [vmem:[#allocation7 + $0x80] ss:$12 sps:$4 sm:$0xff]  }
  0x6b   :  { %300 = vmatpush1.bf16.msra.mxu1 %v3382_v15  ;;  %563 = vmatpush1.bf16.msra.mxu0 %v3919_v16  ;;  %v110_v49 = vld [vmem:[#allocation4 + $0x30] sm:$0xff]  ;;  %v111_v50 = vld [vmem:[#allocation4 + $0x38] sm:$0xff]  ;;  %v3416_v54 = vld [vmem:[#allocation10] sm:$0xff]   ;;  %v156_v5 = vsub.s32 1, %v151_v1 }
  0x6c   :  { %301 = vmatprep.subr.bf16.mxu1 %v3384_v17  ;;  %564 = vmatprep.subr.bf16.mxu0 %v3922_v18  ;;  %v3414_v51 = vld [vmem:[#allocation7 + $0x98] ss:$12 sps:$4 sm:$0xff]   ;;  %v115_v52 = vpack.c.bf16 %v111_v50, %v110_v49  ;;  %v3415_v53 = vld [vmem:[#allocation7 + $0xb0] ss:$12 sps:$4 sm:$0xff]   ;;  %v3417_v56 = vld [vmem:[#allocation10 + $0x8] sm:$0xff]  }
  0x6d   :  { %v3418_v57 = vld [vmem:[#allocation10 + $0x10] sm:$0xff]   ;;  %v3419_v58 = vld [vmem:[#allocation10 + $0x18] sm:$0xff]   ;;  %v3420_v59 = vld [vmem:[#allocation10 + $0x20] sm:$0xff]  }
  0x6e   :  { %v3421_v60 = vld [vmem:[#allocation10 + $0x28] sm:$0xff]   ;;  %v3422_v61 = vld [vmem:[#allocation10 + $0x30] sm:$0xff]   ;;  %v3423_v62 = vld [vmem:[#allocation10 + $0x38] sm:$0xff]  }
  0x6f   :  { %302 = vmatpush1.bf16.msra.mxu1 %v3388_v19  ;;  %565 = vmatpush1.bf16.msra.mxu0 %v3924_v20  ;;  %v148_v3 = vld [vmem:[%s4335_s2] sm:$0x7] }
  0x70   :  { %303 = vmatprep.subr.bf16.mxu1 %v3390_v21  ;;  %566 = vmatprep.subr.bf16.mxu0 %v3928_v22  ;;  %v157_v9 = vrot.slane %v148_v3, %v156_v5 }
  0x73   :  { %304 = vmatpush1.bf16.msra.mxu1 %v3394_v23  ;;  %567 = vmatpush1.bf16.msra.mxu0 %v3931_v24 }
  0x74   :  { %305 = vmatprep.subr.bf16.mxu1 %v3396_v25  ;;  %568 = vmatprep.subr.bf16.mxu0 %v3934_v26 }
  0x77   :  { %306 = vmatpush1.bf16.msra.mxu1 %v3400_v27  ;;  %569 = vmatpush1.bf16.msra.mxu0 %v3937_v28 }
  0x78   :  { %307 = vmatprep.subr.bf16.mxu1 %v3402_v29  ;;  %570 = vmatprep.subr.bf16.mxu0 %v3940_v30 }
  0x7b   :  { %308 = vmatpush1.bf16.msra.mxu1 %v3406_v31  ;;  %571 = vmatpush1.bf16.msra.mxu0 %v3942_v32 }
  0x7c   :  { %3135 = vmatprep.subr.bf16.mxu1 %v3408_v35  ;;  %824 = vmatprep.subr.bf16.mxu0 %v3899_v2 }
  0x7e   :  { %326 = vmatmul.mubr.bf16.vlgmr.msra.gmra.mrb[0].mxu1 %v112_v36  ;;  %589 = vmatmul.mubr.bf16.vlgmr.msra.gmra.mrb[0].mxu0 %v3775_v40 }
  0x7f   :  { %3136 = vmatpush3.bf16.msra.mxu1 %v3408_v35  ;;  %335 = vmatprep.mubr.bf16.mxu1 %v3774_v0 }
  0x80   :  { %3137 = vmatprep.subr.bf16.mxu1 %v3409_v37  ;;  %825 = vmatpush1.bf16.msra.mxu0 %v3901_v4 }
  0x81   :  { %826 = vmatprep.subr.bf16.mxu0 %v3905_v6  ;;  %856 = vmatprep.mubr.bf16.mxu0 %v3774_v0 }
  0x83   :  { %3138 = vmatpush3.bf16.msra.mxu1 %v3409_v37 }
  0x84   :  { %3139 = vmatprep.subr.bf16.mxu1 %v3410_v41  ;;  %827 = vmatpush1.bf16.msra.mxu0 %v3907_v8 }
  0x85   :  { %828 = vmatprep.subr.bf16.mxu0 %v3910_v10 }
  0x86   :  { %336 = vmatmul.mubr.bf16.gmra.mrb[4].mxu1 %v113_v42 }
  0x87   :  { %3140 = vmatpush3.bf16.msra.mxu1 %v3410_v41  ;;  %345 = vmatprep.mubr.bf16.mxu1 %v3774_v0 }
  0x88   :  { %3141 = vmatprep.subr.bf16.mxu1 %v3411_v43  ;;  %829 = vmatpush1.bf16.msra.mxu0 %v3912_v12 }
  0x89   :  { %830 = vmatprep.subr.bf16.mxu0 %v3916_v14 }
  0x8b   :  { %3142 = vmatpush3.bf16.msra.mxu1 %v3411_v43 }
  0x8c   :  { %3143 = vmatprep.subr.bf16.mxu1 %v3412_v46  ;;  %831 = vmatpush1.bf16.msra.mxu0 %v3919_v16 }
  0x8d   :  { %832 = vmatprep.subr.bf16.mxu0 %v3922_v18 }
  0x8e   :  { %346 = vmatmul.mubr.bf16.gmra.mrb[8].mxu1 %v114_v47 }
  0x8f   :  { %3144 = vmatpush3.bf16.msra.mxu1 %v3412_v46  ;;  %355 = vmatprep.mubr.bf16.mxu1 %v3774_v0 }
  0x90   :  { %3145 = vmatprep.subr.bf16.mxu1 %v3413_v48  ;;  %833 = vmatpush1.bf16.msra.mxu0 %v3924_v20 }
  0x91   :  { %834 = vmatprep.subr.bf16.mxu0 %v3928_v22 }
  0x93   :  { %3146 = vmatpush3.bf16.msra.mxu1 %v3413_v48 }
  0x94   :  { %3147 = vmatprep.subr.bf16.mxu1 %v3414_v51  ;;  %835 = vmatpush1.bf16.msra.mxu0 %v3931_v24 }
  0x95   :  { %836 = vmatprep.subr.bf16.mxu0 %v3934_v26 }
  0x96   :  { %356 = vmatmul.mubr.bf16.gmra.mrb[12].mxu1 %v115_v52 }
  0x97   :  { %3148 = vmatpush3.bf16.msra.mxu1 %v3414_v51  ;;  %3151 = vmatprep.mubr.bf16.mxu1 %v112_v36 }
  0x98   :  { %3149 = vmatprep.subr.bf16.mxu1 %v3415_v53  ;;  %837 = vmatpush1.bf16.msra.mxu0 %v3937_v28 }
  0x99   :  { %838 = vmatprep.subr.bf16.mxu0 %v3940_v30 }
  0x9b   :  { %3150 = vmatpush3.bf16.msra.mxu1 %v3415_v53 }
  0x9c   :  { %839 = vmatpush1.bf16.msra.mxu0 %v3942_v32  ;;  %3159 = vmatprep.subr.bf16.mxu1 %v3776_v55 }
  0x9d   :  { %1093 = vmatprep.subr.bf16.mxu0 %v3899_v2  ;;  %v152_v2 = vsub.s32 0, %v151_v1 }
  0x9e   :  { %3152 = vmatmul.mubr.bf16.vlgmr.msra.gmra.mrb[16].mxu1 %v113_v42 }
  0x9f   :  { %3155 = vmatprep.mubr.bf16.mxu1 %v114_v47  ;;  %3160 = vmatpush3.bf16.msra.mxu1 %v3416_v54  ;;  %v153_v7 = vrot.slane %v148_v3, %v152_v2 }
  0xa0   :  { %3161 = vmatprep.subr.bf16.mxu1 %v3776_v55 }
  0xa3   :  { %3162 = vmatpush3.bf16.msra.mxu1 %v3417_v56 }
  0xa4   :  { %3163 = vmatprep.subr.bf16.mxu1 %v3776_v55 }
  0xa6   :  { %3156 = vmatmul.mubr.bf16.gmra.mrb[20].mxu1 %v115_v52 }
  0xa7   :  { %3164 = vmatpush3.bf16.msra.mxu1 %v3418_v57  ;;  %3175 = vmatprep.mubr.msk.bf16.mxu1 %vm3777_vm0, %v3776_v55 }
  0xa8   :  { %3165 = vmatprep.subr.bf16.mxu1 %v3776_v55 }
  0xab   :  { %3166 = vmatpush3.bf16.msra.mxu1 %v3419_v58 }
  0xac   :  { %3167 = vmatprep.subr.bf16.mxu1 %v3776_v55 }
  0xaf   :  { %3168 = vmatpush3.bf16.msra.mxu1 %v3420_v59  ;;  %v160_v59 = vsub.s32 2, %v151_v1 }
  0xb0   :  { %3169 = vmatprep.subr.bf16.mxu1 %v3776_v55 }
  0xb1   :  { %v161_v5 = vrot.slane %v148_v3, %v160_v59 }
  0xb3   :  { %3170 = vmatpush3.bf16.msra.mxu1 %v3421_v60 }
  0xb4   :  { %3171 = vmatprep.subr.bf16.mxu1 %v3776_v55 }
  0xb7   :  { %3172 = vmatpush3.bf16.msra.mxu1 %v3422_v61 }
  0xb8   :  { %3173 = vmatprep.subr.bf16.mxu1 %v3776_v55 }
  0xbb   :  { %3174 = vmatpush3.bf16.msra.mxu1 %v3423_v62 }
  0xbc   :  { %3179 = vmatprep.subr.bf16.mxu1 %v3776_v55 }
 0x151   :  { %v327_v11 = vpop.f32.mrb[0].mxu1  ;;  %v590_v13 = vpop.f32.mrb[0].mxu0 }
 0x152   :  { %v328_v15 = vadd.f32 %v327_v11, %v153_v7  ;;  %v329_v17 = vpop.f32.mrb[1].mxu1  ;;  %v592_v19 = vpop.f32.mrb[1].mxu0 }
 0x153   :  { %v330_v21 = vadd.f32 %v329_v17, %v157_v9  ;;  %v331_v23 = vpop.f32.mrb[2].mxu1  ;;  %v594_v25 = vpop.f32.mrb[2].mxu0 }
 0x154   :  { %v597_v27 = vadd.f32 %v590_v13, %v328_v15  ;;  %v3982_v29 = vadd.f32 %v331_v23, %v153_v7  ;;  %v333_v31 = vpop.f32.mrb[3].mxu1  ;;  %v595_v33 = vpop.f32.mrb[3].mxu0 }
 0x155   :  { %v604_v34 = vadd.f32 %v592_v19, %v330_v21  ;;  %v3984_v35 = vadd.f32 %v333_v31, %v157_v9 }
 0x157   :  { %v2839_v36 = vmul.f32 -1.442695, %v604_v34 }
 0x159   :  { %3512 = vpow2.f32 %v2839_v36  ;;  %v337_v37 = vpop.f32.mrb[4].mxu1 }
 0x15a   :  { %v3986_v38 = vadd.f32 %v337_v37, %v153_v7  ;;  %v339_v39 = vpop.f32.mrb[5].mxu1 }
 0x15b   :  { %v3988_v40 = vadd.f32 %v339_v39, %v157_v9  ;;  %v341_v41 = vpop.f32.mrb[6].mxu1 }
 0x15c   :  { %v3990_v42 = vadd.f32 %v341_v41, %v153_v7  ;;  %v343_v43 = vpop.f32.mrb[7].mxu1  ;;  %v2838_v41 = vmul.f32 -1.442695, %v597_v27 }
 0x15d   :  { %v3992_v44 = vadd.f32 %v343_v43, %v157_v9 }
 0x161   :  { %v347_v45 = vpop.f32.mrb[8].mxu1 }
 0x162   :  { %v3994_v46 = vadd.f32 %v347_v45, %v153_v7  ;;  %v349_v47 = vpop.f32.mrb[9].mxu1 }
 0x163   :  { %v3513_v48 = vpop.eup %3512  ;;  %v3996_v49 = vadd.f32 %v349_v47, %v157_v9  ;;  %v351_v50 = vpop.f32.mrb[10].mxu1 }
 0x164   :  { %v608_v51 = vadd.f32 1.0, %v3513_v48  ;;  %v3998_v52 = vadd.f32 %v351_v50, %v153_v7  ;;  %v353_v53 = vpop.f32.mrb[11].mxu1 }
 0x165   :  { %v4000_v54 = vadd.f32 %v353_v53, %v157_v9 }
 0x166   :  { %3514 = vrcp.f32 %v608_v51 }
 0x167   :  { %3516 = vpow2.f32 %v2838_v41 }
 0x169   :  { %v357_v56 = vpop.f32.mrb[12].mxu1 }
 0x16a   :  { %v4002_v57 = vadd.f32 %v357_v56, %v153_v7  ;;  %v359_v58 = vpop.f32.mrb[13].mxu1 }
 0x16b   :  { %v4004_v60 = vadd.f32 %v359_v58, %v157_v9  ;;  %v361_v61 = vpop.f32.mrb[14].mxu1 }
 0x16c   :  { %v4006_v62 = vadd.f32 %v361_v61, %v153_v7  ;;  %v363_v63 = vpop.f32.mrb[15].mxu1 }
 0x16d   :  { %v4008_v2 = vadd.f32 %v363_v63, %v157_v9 }
 0x170   :  { %v3515_v11 = vpop.eup %3514 }
 0x171   :  { %v611_v13 = vmul.f32 0.0, %v3515_v11  ;;  %v3153_v15 = vpop.f32.mrb[16].mxu1  ;;  %v3517_v43 = vpop.eup %3516 }
 0x172   :  { %v4010_v17 = vadd.f32 %v3153_v15, %v161_v5  ;;  %v400_v19 = vpop.f32.mrb[17].mxu1  ;;  %v601_v45 = vadd.f32 1.0, %v3517_v43 }
 0x173   :  { %v612_v21 = vpack.c.bf16 %v611_v13, %v611_v13  ;;  %v3154_v23 = vpop.f32.mrb[18].mxu1  ;;  %v401_v47 = vadd.f32 %v400_v19, %v161_v5 }
 0x174   :  { %v4012_v25 = vadd.f32 %v3154_v23, %v161_v5  ;;  %v403_v1 = vpop.f32.mrb[19].mxu1  ;;  %3518 = vrcp.f32 %v601_v45 }
 0x175   :  { %3176 = vmatmul.mubr.bf16.vlgmr.msra.gmra.mrb[24].mxu1 %v612_v21  ;;  %v4014_v31 = vadd.f32 %v403_v1, %v161_v5 }
 0x176   :  { %3195 = vmatprep.mubr.msk.bf16.mxu1 %vm3777_vm0, %v3776_v55 }
 0x179   :  { %v3157_v7 = vpop.f32.mrb[20].mxu1 }
 0x17a   :  { %v4018_v9 = vadd.f32 %v3157_v7, %v161_v5  ;;  %v416_v3 = vpop.f32.mrb[21].mxu1 }
 0x17b   :  { %v4020_v33 = vadd.f32 %v416_v3, %v161_v5  ;;  %v3158_v34 = vpop.f32.mrb[22].mxu1 }
 0x17c   :  { %v4022_v36 = vadd.f32 %v3158_v34, %v161_v5  ;;  %v419_v37 = vpop.f32.mrb[23].mxu1 }
 0x17d   :  { %v4024_v39 = vadd.f32 %v419_v37, %v161_v5 }
 0x17e   :  { %v3519_v58 = vpop.eup %3518 }
 0x248   :  { %v711_v48 = vpop.f32.mrb[24].mxu1 }
 0x249   :  { %v717_v50 = vadd.f32 %v711_v48, %v401_v47  ;;  %v3177_v51 = vpop.f32.mrb[25].mxu1 }
 0x24a   :  { %v714_v53 = vpop.f32.mrb[26].mxu1 }
 0x24b   :  { %3520 = vtanh.f32 %v717_v50  ;;  %v3178_v56 = vpop.f32.mrb[27].mxu1 }
 0x255   :  { %v3521_v59 = vpop.eup %3520 }
 0x256   :  { %v4026_v61 = vmul.f32 %v3521_v59, %v3519_v58 }
 0x258   :  { %722 = vst [vmem:[#allocation14] sm:$0xff] %v4026_v61  ;;  %v727_v27 = vpack.c.bf16 %v4026_v61, %v4026_v61 }
 0x25a   :  { %857 = vmatmul.mubr.bf16.vlgmr.msra.gmra.mrb[4].mxu0 %v727_v27  ;;  %v3433_v27 = vld [vmem:[#allocation10 + $0x8] sm:$0xff]  }
 0x25b   :  { %1094 = vmatpush1.bf16.msra.mxu0 %v3901_v4  ;;  %1125 = vmatprep.mubr.bf16.mxu0 %v3774_v0  ;;  %v3424_v4 = vld [vmem:[#allocation10] sm:$0xff]  }
 0x25c   :  { %1095 = vmatprep.subr.bf16.mxu0 %v3905_v6  ;;  %3180 = vmatpush3.bf16.msra.mxu1 %v3424_v4  ;;  %v3425_v6 = vld [vmem:[#allocation10 + $0x8] sm:$0xff]   ;;  %v3434_v4 = vld [vmem:[#allocation10 + $0x10] sm:$0xff]  }
 0x25d   :  { %3181 = vmatprep.subr.bf16.mxu1 %v3776_v55 }
 0x25f   :  { %1096 = vmatpush1.bf16.msra.mxu0 %v3907_v8  ;;  %v3426_v8 = vld [vmem:[#allocation10 + $0x10] sm:$0xff]  }
 0x260   :  { %1097 = vmatprep.subr.bf16.mxu0 %v3910_v10  ;;  %3182 = vmatpush3.bf16.msra.mxu1 %v3425_v6  ;;  %v3427_v10 = vld [vmem:[#allocation10 + $0x18] sm:$0xff]   ;;  %v3436_v6 = vld [vmem:[#allocation10 + $0x20] sm:$0xff]  }
 0x261   :  { %3183 = vmatprep.subr.bf16.mxu1 %v3776_v55 }
 0x263   :  { %1098 = vmatpush1.bf16.msra.mxu0 %v3912_v12  ;;  %v3428_v12 = vld [vmem:[#allocation10 + $0x20] sm:$0xff]  }
 0x264   :  { %1099 = vmatprep.subr.bf16.mxu0 %v3916_v14  ;;  %3184 = vmatpush3.bf16.msra.mxu1 %v3426_v8  ;;  %v3429_v14 = vld [vmem:[#allocation10 + $0x28] sm:$0xff]  }
 0x265   :  { %3185 = vmatprep.subr.bf16.mxu1 %v3776_v55  ;;  %v3437_v8 = vld [vmem:[#allocation10 + $0x28] sm:$0xff]  }
 0x267   :  { %1100 = vmatpush1.bf16.msra.mxu0 %v3919_v16  ;;  %v3430_v16 = vld [vmem:[#allocation10 + $0x30] sm:$0xff]  }
 0x268   :  { %1101 = vmatprep.subr.bf16.mxu0 %v3922_v18  ;;  %3186 = vmatpush3.bf16.msra.mxu1 %v3427_v10  ;;  %v3431_v18 = vld [vmem:[#allocation10 + $0x38] sm:$0xff]   ;;  %v3438_v10 = vld [vmem:[#allocation10 + $0x30] sm:$0xff]  }
 0x269   :  { %3187 = vmatprep.subr.bf16.mxu1 %v3776_v55 }
 0x26b   :  { %1102 = vmatpush1.bf16.msra.mxu0 %v3924_v20 }
 0x26c   :  { %1103 = vmatprep.subr.bf16.mxu0 %v3928_v22  ;;  %3188 = vmatpush3.bf16.msra.mxu1 %v3428_v12  ;;  %v3439_v12 = vld [vmem:[#allocation10 + $0x38] sm:$0xff]  }
 0x26d   :  { %3189 = vmatprep.subr.bf16.mxu1 %v3776_v55 }
 0x26f   :  { %1104 = vmatpush1.bf16.msra.mxu0 %v3931_v24 }
 0x270   :  { %1105 = vmatprep.subr.bf16.mxu0 %v3934_v26  ;;  %3190 = vmatpush3.bf16.msra.mxu1 %v3429_v14  ;;  %v4077_v14 = vld [vmem:[#allocation9] ss:$8 sps:$4 sm:$0xff]  }
 0x271   :  { %3191 = vmatprep.subr.bf16.mxu1 %v3776_v55 }
 0x273   :  { %1106 = vmatpush1.bf16.msra.mxu0 %v3937_v28 }
 0x274   :  { %1107 = vmatprep.subr.bf16.mxu0 %v3940_v30  ;;  %3192 = vmatpush3.bf16.msra.mxu1 %v3430_v16  ;;  %v4079_v16 = vld [vmem:[#allocation9 + $0x4] ss:$8 sps:$4 sm:$0xff]  }
 0x275   :  { %3193 = vmatprep.subr.bf16.mxu1 %v3776_v55 }
 0x277   :  { %1108 = vmatpush1.bf16.msra.mxu0 %v3942_v32 }
 0x278   :  { %3194 = vmatpush3.bf16.msra.mxu1 %v3431_v18  ;;  %1362 = vmatprep.subr.bf16.mxu0 %v4079_v16  ;;  %v3592_v18 = vld [vmem:[#allocation9 + $0x14] ss:$8 sps:$4 sm:$0xff]  }
 0x279   :  { %3199 = vmatprep.subr.bf16.mxu1 %v3776_v55 }
 0x32d   :  { %v858_v63 = vpop.f32.mrb[4].mxu0 }
 0x32e   :  { %v865_v5 = vadd.f32 %v858_v63, %v3982_v29  ;;  %v860_v11 = vpop.f32.mrb[5].mxu0  ;;  %v3593_v63 = vld [vmem:[#allocation9 + $0x10] ss:$8 sps:$4 sm:$0xff]  }
 0x32f   :  { %v872_v13 = vadd.f32 %v860_v11, %v3984_v35  ;;  %v862_v15 = vpop.f32.mrb[6].mxu0  ;;  %v3595_v11 = vld [vmem:[#allocation9 + $0x20] ss:$8 sps:$4 sm:$0xff]  }
 0x330   :  { %v863_v19 = vpop.f32.mrb[7].mxu0  ;;  %v2864_v37 = vmul.f32 -1.442695, %v865_v5  ;;  %v3594_v5 = vld [vmem:[#allocation9 + $0x24] ss:$8 sps:$4 sm:$0xff]  }
 0x331   :  { %v2865_v21 = vmul.f32 -1.442695, %v872_v13  ;;  %v3596_v13 = vld [vmem:[#allocation9 + $0x34] ss:$8 sps:$4 sm:$0xff]   ;;  %v3597_v15 = vld [vmem:[#allocation9 + $0x30] ss:$8 sps:$4 sm:$0xff]  }
 0x332   :  { %v3598_v19 = vld [vmem:[#allocation9 + $0x44] ss:$8 sps:$4 sm:$0xff]  }
 0x333   :  { %3522 = vpow2.f32 %v2865_v21 }
 0x33d   :  { %v3523_v23 = vpop.eup %3522 }
 0x33e   :  { %v876_v1 = vadd.f32 1.0, %v3523_v23 }
 0x340   :  { %3524 = vrcp.f32 %v876_v1 }
 0x341   :  { %3526 = vpow2.f32 %v2864_v37 }
 0x34a   :  { %v3525_v7 = vpop.eup %3524 }
 0x34b   :  { %v879_v3 = vmul.f32 %v3525_v7, %v4026_v61  ;;  %v3527_v29 = vpop.eup %3526 }
 0x34c   :  { %v869_v35 = vadd.f32 1.0, %v3527_v29 }
 0x34d   :  { %v880_v34 = vpack.c.bf16 %v879_v3, %v879_v3 }
 0x34f   :  { %3196 = vmatmul.mubr.bf16.vlgmr.msra.gmra.mrb[28].mxu1 %v880_v34 }
 0x350   :  { %3215 = vmatprep.mubr.msk.bf16.mxu1 %vm3777_vm0, %v3776_v55 }
 0x422   :  { %v979_v41 = vpop.f32.mrb[28].mxu1 }
 0x423   :  { %v985_v43 = vadd.f32 %v979_v41, %v4014_v31  ;;  %v3197_v45 = vpop.f32.mrb[29].mxu1  ;;  %v3432_v31 = vld [vmem:[#allocation10] sm:$0xff]  }
 0x424   :  { %v982_v47 = vpop.f32.mrb[30].mxu1  ;;  %3200 = vmatpush3.bf16.msra.mxu1 %v3432_v31  ;;  %v3447_v31 = vld [vmem:[#allocation10 + $0x20] sm:$0xff]  }
 0x425   :  { %3528 = vtanh.f32 %v985_v43  ;;  %v3198_v48 = vpop.f32.mrb[31].mxu1  ;;  %3201 = vmatprep.subr.bf16.mxu1 %v3776_v55 }
 0x426   :  { %3530 = vrcp.f32 %v869_v35 }
 0x428   :  { %3202 = vmatpush3.bf16.msra.mxu1 %v3433_v27  ;;  %v3448_v27 = vld [vmem:[#allocation10 + $0x28] sm:$0xff]  }
 0x429   :  { %3203 = vmatprep.subr.bf16.mxu1 %v3776_v55 }
 0x42c   :  { %3204 = vmatpush3.bf16.msra.mxu1 %v3434_v4  ;;  %v3449_v4 = vld [vmem:[#allocation10 + $0x30] sm:$0xff]  }
 0x42d   :  { %3205 = vmatprep.subr.bf16.mxu1 %v3776_v55 }
 0x42f   :  { %v3529_v50 = vpop.eup %3528 }
 0x430   :  { %v987_v51 = vsub.f32 %v3529_v50, %v4026_v61  ;;  %v3531_v53 = vpop.eup %3530 }
 0x432   :  { %v988_v56 = vmul.f32 %v3531_v53, %v987_v51 }
 0x434   :  { %v4063_v58 = vadd.f32 %v988_v56, %v4026_v61  ;;  %v3435_v61 = vld [vmem:[#allocation10 + $0x18] sm:$0xff]   ;;  %v3444_v56 = vld [vmem:[#allocation10 + $0x8] sm:$0xff]  }
 0x435   :  { %3206 = vmatpush3.bf16.msra.mxu1 %v3435_v61  ;;  %v3450_v61 = vld [vmem:[#allocation10 + $0x38] sm:$0xff]  }
 0x436   :  { %991 = vst [vmem:[#allocation14 + $0x8] sm:$0xff] %v4063_v58  ;;  %v996_v59 = vpack.c.bf16 %v4063_v58, %v4063_v58  ;;  %3207 = vmatprep.subr.bf16.mxu1 %v3776_v55 }
 0x438   :  { %1126 = vmatmul.mubr.bf16.vlgmr.msra.gmra.mrb[8].mxu0 %v996_v59  ;;  %v3446_v59 = vld [vmem:[#allocation10 + $0x18] sm:$0xff]  }
 0x439   :  { %1394 = vmatprep.mubr.bf16.mxu0 %v3774_v0  ;;  %3208 = vmatpush3.bf16.msra.mxu1 %v3436_v6  ;;  %v4114_v6 = vld [vmem:[#allocation9 + $0x10] ss:$8 sps:$4 sm:$0xff]  }
 0x43a   :  { %3209 = vmatprep.subr.bf16.mxu1 %v3776_v55  ;;  %1363 = vmatpush1.bf16.msra.mxu0 %v4077_v14 }
 0x43b   :  { %1364 = vmatprep.subr.bf16.mxu0 %v3592_v18 }
 0x43d   :  { %3210 = vmatpush3.bf16.msra.mxu1 %v3437_v8  ;;  %v4116_v8 = vld [vmem:[#allocation9 + $0x14] ss:$8 sps:$4 sm:$0xff]  }
 0x43e   :  { %3211 = vmatprep.subr.bf16.mxu1 %v3776_v55  ;;  %1365 = vmatpush1.bf16.msra.mxu0 %v3593_v63 }
 0x43f   :  { %1366 = vmatprep.subr.bf16.mxu0 %v3594_v5 }
 0x441   :  { %3212 = vmatpush3.bf16.msra.mxu1 %v3438_v10  ;;  %v4118_v10 = vld [vmem:[#allocation9 + $0x24] ss:$8 sps:$4 sm:$0xff]  }
 0x442   :  { %3213 = vmatprep.subr.bf16.mxu1 %v3776_v55  ;;  %1367 = vmatpush1.bf16.msra.mxu0 %v3595_v11 }
 0x443   :  { %1368 = vmatprep.subr.bf16.mxu0 %v3596_v13 }
 0x445   :  { %3214 = vmatpush3.bf16.msra.mxu1 %v3439_v12  ;;  %v4122_v12 = vld [vmem:[#allocation9 + $0x20] ss:$8 sps:$4 sm:$0xff]  }
 0x446   :  { %3219 = vmatprep.subr.bf16.mxu1 %v3776_v55  ;;  %1369 = vmatpush1.bf16.msra.mxu0 %v3597_v15 }
 0x447   :  { %1370 = vmatprep.subr.bf16.mxu0 %v3598_v19 }
 0x44a   :  { %1371 = vmatpush1.bf16.msra.mxu0 %v3924_v20 }
 0x44b   :  { %1372 = vmatprep.subr.bf16.mxu0 %v3928_v22 }
 0x44e   :  { %1373 = vmatpush1.bf16.msra.mxu0 %v3931_v24 }
 0x44f   :  { %1374 = vmatprep.subr.bf16.mxu0 %v3934_v26 }
 0x452   :  { %1375 = vmatpush1.bf16.msra.mxu0 %v3937_v28 }
 0x453   :  { %1376 = vmatprep.subr.bf16.mxu0 %v3940_v30 }
 0x456   :  { %1377 = vmatpush1.bf16.msra.mxu0 %v3942_v32 }
 0x457   :  { %1631 = vmatprep.subr.bf16.mxu0 %v4079_v16 }
 0x50b   :  { %v1127_v21 = vpop.f32.mrb[8].mxu0 }
 0x50c   :  { %v1134_v23 = vadd.f32 %v1127_v21, %v3986_v38  ;;  %v1129_v1 = vpop.f32.mrb[9].mxu0 }
 0x50d   :  { %v1141_v20 = vadd.f32 %v1129_v1, %v3988_v40  ;;  %v1131_v7 = vpop.f32.mrb[10].mxu0 }
 0x50e   :  { %v1132_v22 = vpop.f32.mrb[11].mxu0  ;;  %v2890_v32 = vmul.f32 -1.442695, %v1134_v23 }
 0x50f   :  { %v2891_v3 = vmul.f32 -1.442695, %v1141_v20  ;;  %v4131_v22 = vld [vmem:[#allocation9 + $0x34] ss:$8 sps:$4 sm:$0xff]  }
 0x511   :  { %3532 = vpow2.f32 %v2891_v3  ;;  %v4139_v3 = vld [vmem:[#allocation9 + $0x40] ss:$8 sps:$4 sm:$0xff]  }
 0x51b   :  { %v3533_v24 = vpop.eup %3532 }
 0x51c   :  { %v1145_v26 = vadd.f32 1.0, %v3533_v24  ;;  %v4143_v24 = vld [vmem:[#allocation9 + $0x54] ss:$8 sps:$4 sm:$0xff]  }
 0x51e   :  { %3534 = vrcp.f32 %v1145_v26  ;;  %v4145_v26 = vld [vmem:[#allocation9 + $0x50] ss:$8 sps:$4 sm:$0xff]  }
 0x51f   :  { %3536 = vpow2.f32 %v2890_v32  ;;  %v4157_v32 = vld [vmem:[#allocation9 + $0x70] ss:$8 sps:$4 sm:$0xff]  }
 0x528   :  { %v3535_v28 = vpop.eup %3534 }
 0x529   :  { %v1148_v30 = vmul.f32 %v3535_v28, %v4063_v58  ;;  %v3537_v38 = vpop.eup %3536  ;;  %v4149_v28 = vld [vmem:[#allocation9 + $0x64] ss:$8 sps:$4 sm:$0xff]  }
 0x52a   :  { %v1138_v40 = vadd.f32 1.0, %v3537_v38 }
 0x52b   :  { %v1149_v34 = vpack.c.bf16 %v1148_v30, %v1148_v30  ;;  %v4151_v30 = vld [vmem:[#allocation9 + $0x60] ss:$8 sps:$4 sm:$0xff]  }
 0x52d   :  { %3216 = vmatmul.mubr.bf16.vlgmr.msra.gmra.mrb[32].mxu1 %v1149_v34  ;;  %v4155_v34 = vld [vmem:[#allocation9 + $0x74] ss:$8 sps:$4 sm:$0xff]  }
 0x52e   :  { %3235 = vmatprep.mubr.msk.bf16.mxu1 %vm3777_vm0, %v3776_v55 }
 0x600   :  { %v1248_v37 = vpop.f32.mrb[32].mxu1 }
 0x601   :  { %v1254_v29 = vadd.f32 %v1248_v37, %v4010_v17  ;;  %v3217_v41 = vpop.f32.mrb[33].mxu1  ;;  %v3443_v17 = vld [vmem:[#allocation10] sm:$0xff]  }
 0x602   :  { %v1251_v35 = vpop.f32.mrb[34].mxu1  ;;  %3220 = vmatpush3.bf16.msra.mxu1 %v3443_v17 }
 0x603   :  { %3538 = vtanh.f32 %v1254_v29  ;;  %v3218_v43 = vpop.f32.mrb[35].mxu1  ;;  %3221 = vmatprep.subr.bf16.mxu1 %v3776_v55 }
 0x604   :  { %3540 = vrcp.f32 %v1138_v40 }
 0x606   :  { %3222 = vmatpush3.bf16.msra.mxu1 %v3444_v56 }
 0x607   :  { %3223 = vmatprep.subr.bf16.mxu1 %v3776_v55 }
 0x60d   :  { %v3539_v45 = vpop.eup %3538 }
 0x60e   :  { %v1256_v47 = vsub.f32 %v3539_v45, %v4063_v58  ;;  %v3541_v48 = vpop.eup %3540 }
 0x610   :  { %v1257_v50 = vmul.f32 %v3541_v48, %v1256_v47 }
 0x612   :  { %v4099_v51 = vadd.f32 %v1257_v50, %v4063_v58  ;;  %v3445_v58 = vld [vmem:[#allocation10 + $0x10] sm:$0xff]  }
 0x613   :  { %3224 = vmatpush3.bf16.msra.mxu1 %v3445_v58  ;;  %v3474_v58 = vld [vmem:[#allocation10 + $0x10] sm:$0xff]  }
 0x614   :  { %1260 = vst [vmem:[#allocation14 + $0x10] sm:$0xff] %v4099_v51  ;;  %v1265_v53 = vpack.c.bf16 %v4099_v51, %v4099_v51  ;;  %3225 = vmatprep.subr.bf16.mxu1 %v3776_v55 }
 0x616   :  { %1395 = vmatmul.mubr.bf16.vlgmr.msra.gmra.mrb[12].mxu0 %v1265_v53 }
 0x617   :  { %1632 = vmatpush1.bf16.msra.mxu0 %v4077_v14  ;;  %1663 = vmatprep.mubr.bf16.mxu0 %v3774_v0 }
 0x618   :  { %3226 = vmatpush3.bf16.msra.mxu1 %v3446_v59  ;;  %1633 = vmatprep.subr.bf16.mxu0 %v4116_v8  ;;  %v3475_v59 = vld [vmem:[#allocation10 + $0x18] sm:$0xff]  }
 0x619   :  { %3227 = vmatprep.subr.bf16.mxu1 %v3776_v55 }
 0x61b   :  { %1634 = vmatpush1.bf16.msra.mxu0 %v4114_v6 }
 0x61c   :  { %3228 = vmatpush3.bf16.msra.mxu1 %v3447_v31  ;;  %1635 = vmatprep.subr.bf16.mxu0 %v4118_v10  ;;  %v3476_v31 = vld [vmem:[#allocation10 + $0x20] sm:$0xff]  }
 0x61d   :  { %3229 = vmatprep.subr.bf16.mxu1 %v3776_v55 }
 0x61f   :  { %1636 = vmatpush1.bf16.msra.mxu0 %v4122_v12 }
 0x620   :  { %3230 = vmatpush3.bf16.msra.mxu1 %v3448_v27  ;;  %1637 = vmatprep.subr.bf16.mxu0 %v4131_v22  ;;  %v3477_v27 = vld [vmem:[#allocation10 + $0x28] sm:$0xff]  }
 0x621   :  { %3231 = vmatprep.subr.bf16.mxu1 %v3776_v55 }
 0x624   :  { %3232 = vmatpush3.bf16.msra.mxu1 %v3449_v4  ;;  %v3478_v4 = vld [vmem:[#allocation10 + $0x30] sm:$0xff]  }
 0x625   :  { %3233 = vmatprep.subr.bf16.mxu1 %v3776_v55 }
 0x628   :  { %3234 = vmatpush3.bf16.msra.mxu1 %v3450_v61  ;;  %v3479_v61 = vld [vmem:[#allocation10 + $0x38] sm:$0xff]  }
 0x629   :  { %3239 = vmatprep.subr.bf16.mxu1 %v3776_v55 }
 0x6e9   :  { %v1396_v18 = vpop.f32.mrb[12].mxu0 }
 0x6ea   :  { %v1403_v63 = vadd.f32 %v1396_v18, %v3990_v42  ;;  %v1398_v5 = vpop.f32.mrb[13].mxu0  ;;  %v4133_v42 = vld [vmem:[#allocation9 + $0x30] ss:$8 sps:$4 sm:$0xff]  }
 0x6eb   :  { %v1410_v11 = vadd.f32 %v1398_v5, %v3992_v44  ;;  %v1400_v13 = vpop.f32.mrb[14].mxu0  ;;  %1638 = vmatpush1.bf16.msra.mxu0 %v4133_v42  ;;  %v4137_v44 = vld [vmem:[#allocation9 + $0x44] ss:$8 sps:$4 sm:$0xff]  }
 0x6ec   :  { %v1401_v15 = vpop.f32.mrb[15].mxu0  ;;  %1639 = vmatprep.subr.bf16.mxu0 %v4137_v44  ;;  %v2916_v38 = vmul.f32 -1.442695, %v1403_v63 }
 0x6ed   :  { %v2917_v19 = vmul.f32 -1.442695, %v1410_v11 }
 0x6ef   :  { %3542 = vpow2.f32 %v2917_v19  ;;  %1640 = vmatpush1.bf16.msra.mxu0 %v4139_v3 }
 0x6f0   :  { %1641 = vmatprep.subr.bf16.mxu0 %v4143_v24 }
 0x6f3   :  { %1642 = vmatpush1.bf16.msra.mxu0 %v4145_v26 }
 0x6f4   :  { %1643 = vmatprep.subr.bf16.mxu0 %v4149_v28 }
 0x6f7   :  { %1644 = vmatpush1.bf16.msra.mxu0 %v4151_v30 }
 0x6f8   :  { %1645 = vmatprep.subr.bf16.mxu0 %v4155_v34 }
 0x6f9   :  { %v3543_v21 = vpop.eup %3542 }
 0x6fa   :  { %v1414_v23 = vadd.f32 1.0, %v3543_v21 }
 0x6fb   :  { %1646 = vmatpush1.bf16.msra.mxu0 %v4157_v32 }
 0x6fc   :  { %3544 = vrcp.f32 %v1414_v23  ;;  %1900 = vmatprep.subr.bf16.mxu0 %v4079_v16 }
 0x6fd   :  { %3546 = vpow2.f32 %v2916_v38 }
 0x706   :  { %v3545_v1 = vpop.eup %3544 }
 0x707   :  { %v1417_v20 = vmul.f32 %v3545_v1, %v4099_v51  ;;  %v3547_v37 = vpop.eup %3546 }
 0x708   :  { %v1407_v29 = vadd.f32 1.0, %v3547_v37 }
 0x709   :  { %v1418_v7 = vpack.c.bf16 %v1417_v20, %v1417_v20 }
 0x70b   :  { %3236 = vmatmul.mubr.bf16.vlgmr.msra.gmra.mrb[36].mxu1 %v1418_v7 }
 0x70c   :  { %3255 = vmatprep.mubr.msk.bf16.mxu1 %vm3777_vm0, %v3776_v55 }
 0x7de   :  { %v1517_v40 = vpop.f32.mrb[36].mxu1 }
 0x7df   :  { %v1523_v41 = vadd.f32 %v1517_v40, %v4012_v25  ;;  %v3237_v35 = vpop.f32.mrb[37].mxu1  ;;  %v3472_v25 = vld [vmem:[#allocation10] sm:$0xff]  }
 0x7e0   :  { %v1520_v43 = vpop.f32.mrb[38].mxu1  ;;  %3240 = vmatpush3.bf16.msra.mxu1 %v3472_v25  ;;  %v3482_v25 = vld [vmem:[#allocation10 + $0x10] sm:$0xff]  }
 0x7e1   :  { %3548 = vtanh.f32 %v1523_v41  ;;  %v3238_v45 = vpop.f32.mrb[39].mxu1  ;;  %3241 = vmatprep.subr.bf16.mxu1 %v3776_v55 }
 0x7e2   :  { %3550 = vrcp.f32 %v1407_v29 }
 0x7eb   :  { %v3549_v47 = vpop.eup %3548 }
 0x7ec   :  { %v1525_v48 = vsub.f32 %v3549_v47, %v4099_v51  ;;  %v3551_v50 = vpop.eup %3550 }
 0x7ee   :  { %v1526_v53 = vmul.f32 %v3551_v50, %v1525_v48 }
 0x7f0   :  { %v4165_v17 = vadd.f32 %v1526_v53, %v4099_v51  ;;  %v3473_v51 = vld [vmem:[#allocation10 + $0x8] sm:$0xff]  }
 0x7f1   :  { %3242 = vmatpush3.bf16.msra.mxu1 %v3473_v51  ;;  %v3483_v51 = vld [vmem:[#allocation10 + $0x18] sm:$0xff]  }
 0x7f2   :  { %1529 = vst [vmem:[#allocation14 + $0x18] sm:$0xff] %v4165_v17  ;;  %v1534_v56 = vpack.c.bf16 %v4165_v17, %v4165_v17  ;;  %3243 = vmatprep.subr.bf16.mxu1 %v3776_v55 }
 0x7f4   :  { %1664 = vmatmul.mubr.bf16.vlgmr.msra.gmra.mrb[16].mxu0 %v1534_v56  ;;  %v3481_v56 = vld [vmem:[#allocation10 + $0x8] sm:$0xff]  }
 0x7f5   :  { %1901 = vmatpush1.bf16.msra.mxu0 %v4077_v14  ;;  %1932 = vmatprep.mubr.bf16.mxu0 %v3774_v0 }
 0x7f6   :  { %1902 = vmatprep.subr.bf16.mxu0 %v4116_v8  ;;  %3244 = vmatpush3.bf16.msra.mxu1 %v3474_v58  ;;  %v3484_v58 = vld [vmem:[#allocation10 + $0x20] sm:$0xff]  }
 0x7f7   :  { %3245 = vmatprep.subr.bf16.mxu1 %v3776_v55 }
 0x7f9   :  { %1903 = vmatpush1.bf16.msra.mxu0 %v4114_v6 }
 0x7fa   :  { %1904 = vmatprep.subr.bf16.mxu0 %v4118_v10  ;;  %3246 = vmatpush3.bf16.msra.mxu1 %v3475_v59  ;;  %v3485_v59 = vld [vmem:[#allocation10 + $0x28] sm:$0xff]  }
 0x7fb   :  { %3247 = vmatprep.subr.bf16.mxu1 %v3776_v55 }
 0x7fd   :  { %1905 = vmatpush1.bf16.msra.mxu0 %v4122_v12 }
 0x7fe   :  { %1906 = vmatprep.subr.bf16.mxu0 %v4131_v22  ;;  %3248 = vmatpush3.bf16.msra.mxu1 %v3476_v31  ;;  %v3487_v31 = vld [vmem:[#allocation10 + $0x38] sm:$0xff]  }
 0x7ff   :  { %3249 = vmatprep.subr.bf16.mxu1 %v3776_v55 }
 0x801   :  { %1907 = vmatpush1.bf16.msra.mxu0 %v4133_v42 }
 0x802   :  { %1908 = vmatprep.subr.bf16.mxu0 %v4137_v44  ;;  %3250 = vmatpush3.bf16.msra.mxu1 %v3477_v27 }
 0x803   :  { %3251 = vmatprep.subr.bf16.mxu1 %v3776_v55 }
 0x805   :  { %1909 = vmatpush1.bf16.msra.mxu0 %v4139_v3 }
 0x806   :  { %1910 = vmatprep.subr.bf16.mxu0 %v4143_v24  ;;  %3252 = vmatpush3.bf16.msra.mxu1 %v3478_v4 }
 0x807   :  { %3253 = vmatprep.subr.bf16.mxu1 %v3776_v55 }
 0x809   :  { %1911 = vmatpush1.bf16.msra.mxu0 %v4145_v26 }
 0x80a   :  { %1912 = vmatprep.subr.bf16.mxu0 %v4149_v28  ;;  %3254 = vmatpush3.bf16.msra.mxu1 %v3479_v61 }
 0x80b   :  { %3259 = vmatprep.subr.bf16.mxu1 %v3776_v55 }
 0x80d   :  { %1913 = vmatpush1.bf16.msra.mxu0 %v4151_v30 }
 0x80e   :  { %1914 = vmatprep.subr.bf16.mxu0 %v4155_v34 }
 0x811   :  { %1915 = vmatpush1.bf16.msra.mxu0 %v4157_v32 }
 0x812   :  { %2169 = vmatprep.subr.bf16.mxu0 %v4079_v16 }
 0x8c7   :  { %v1665_v18 = vpop.f32.mrb[16].mxu0 }
 0x8c8   :  { %v1672_v63 = vadd.f32 %v1665_v18, %v3994_v46  ;;  %v1667_v5 = vpop.f32.mrb[17].mxu0 }
 0x8c9   :  { %v1679_v11 = vadd.f32 %v1667_v5, %v3996_v49  ;;  %v1669_v13 = vpop.f32.mrb[18].mxu0 }
 0x8ca   :  { %v1670_v15 = vpop.f32.mrb[19].mxu0  ;;  %v2942_v38 = vmul.f32 -1.442695, %v1672_v63 }
 0x8cb   :  { %v2943_v19 = vmul.f32 -1.442695, %v1679_v11 }
 0x8cd   :  { %3552 = vpow2.f32 %v2943_v19 }
 0x8d7   :  { %v3553_v21 = vpop.eup %3552 }
 0x8d8   :  { %v1683_v23 = vadd.f32 1.0, %v3553_v21 }
 0x8da   :  { %3554 = vrcp.f32 %v1683_v23 }
 0x8db   :  { %3556 = vpow2.f32 %v2942_v38 }
 0x8e4   :  { %v3555_v1 = vpop.eup %3554 }
 0x8e5   :  { %v1686_v20 = vmul.f32 %v3555_v1, %v4165_v17  ;;  %v3557_v46 = vpop.eup %3556 }
 0x8e6   :  { %v1676_v49 = vadd.f32 1.0, %v3557_v46 }
 0x8e7   :  { %v1687_v7 = vpack.c.bf16 %v1686_v20, %v1686_v20 }
 0x8e9   :  { %3256 = vmatmul.mubr.bf16.vlgmr.msra.gmra.mrb[40].mxu1 %v1687_v7 }
 0x8ea   :  { %3275 = vmatprep.mubr.msk.bf16.mxu1 %vm3777_vm0, %v3776_v55 }
 0x9bc   :  { %v1786_v37 = vpop.f32.mrb[40].mxu1 }
 0x9bd   :  { %v1792_v40 = vadd.f32 %v1786_v37, %v4020_v33  ;;  %v3257_v29 = vpop.f32.mrb[41].mxu1  ;;  %v3480_v33 = vld [vmem:[#allocation10] sm:$0xff]  }
 0x9be   :  { %v1789_v41 = vpop.f32.mrb[42].mxu1  ;;  %3260 = vmatpush3.bf16.msra.mxu1 %v3480_v33 }
 0x9bf   :  { %3558 = vtanh.f32 %v1792_v40  ;;  %v3258_v35 = vpop.f32.mrb[43].mxu1  ;;  %3261 = vmatprep.subr.bf16.mxu1 %v3776_v55 }
 0x9c0   :  { %3560 = vrcp.f32 %v1676_v49 }
 0x9c2   :  { %3262 = vmatpush3.bf16.msra.mxu1 %v3481_v56 }
 0x9c3   :  { %3263 = vmatprep.subr.bf16.mxu1 %v3776_v55 }
 0x9c6   :  { %3264 = vmatpush3.bf16.msra.mxu1 %v3482_v25 }
 0x9c7   :  { %3265 = vmatprep.subr.bf16.mxu1 %v3776_v55 }
 0x9c9   :  { %v3559_v43 = vpop.eup %3558 }
 0x9ca   :  { %v1794_v45 = vsub.f32 %v3559_v43, %v4165_v17  ;;  %v3561_v47 = vpop.eup %3560  ;;  %3266 = vmatpush3.bf16.msra.mxu1 %v3483_v51 }
 0x9cb   :  { %3267 = vmatprep.subr.bf16.mxu1 %v3776_v55 }
 0x9cc   :  { %v1795_v48 = vmul.f32 %v3561_v47, %v1794_v45 }
 0x9ce   :  { %v4203_v50 = vadd.f32 %v1795_v48, %v4165_v17  ;;  %3268 = vmatpush3.bf16.msra.mxu1 %v3484_v58 }
 0x9cf   :  { %3269 = vmatprep.subr.bf16.mxu1 %v3776_v55 }
 0x9d0   :  { %1798 = vst [vmem:[#allocation14 + $0x20] sm:$0xff] %v4203_v50  ;;  %v1803_v53 = vpack.c.bf16 %v4203_v50, %v4203_v50 }
 0x9d2   :  { %1933 = vmatmul.mubr.bf16.vlgmr.msra.gmra.mrb[20].mxu0 %v1803_v53  ;;  %3270 = vmatpush3.bf16.msra.mxu1 %v3485_v59  ;;  %v3496_v53 = vld [vmem:[#allocation12] sm:$0xff]  }
 0x9d3   :  { %2170 = vmatpush1.bf16.msra.mxu0 %v4077_v14  ;;  %2201 = vmatprep.mubr.bf16.mxu0 %v3774_v0 }
 0x9d4   :  { %2171 = vmatprep.subr.bf16.mxu0 %v4116_v8  ;;  %3271 = vmatprep.subr.bf16.mxu1 %v3776_v55 }
 0x9d7   :  { %2172 = vmatpush1.bf16.msra.mxu0 %v4114_v6 }
 0x9d8   :  { %2173 = vmatprep.subr.bf16.mxu0 %v4118_v10 }
 0x9db   :  { %2174 = vmatpush1.bf16.msra.mxu0 %v4122_v12 }
 0x9dc   :  { %2175 = vmatprep.subr.bf16.mxu0 %v4131_v22 }
 0x9df   :  { %2176 = vmatpush1.bf16.msra.mxu0 %v4133_v42 }
 0x9e0   :  { %2177 = vmatprep.subr.bf16.mxu0 %v4137_v44 }
 0x9e3   :  { %2178 = vmatpush1.bf16.msra.mxu0 %v4139_v3 }
 0x9e4   :  { %2179 = vmatprep.subr.bf16.mxu0 %v4143_v24 }
 0x9e7   :  { %2180 = vmatpush1.bf16.msra.mxu0 %v4145_v26 }
 0x9e8   :  { %2181 = vmatprep.subr.bf16.mxu0 %v4149_v28 }
 0x9eb   :  { %2182 = vmatpush1.bf16.msra.mxu0 %v4151_v30 }
 0x9ec   :  { %2183 = vmatprep.subr.bf16.mxu0 %v4155_v34 }
 0x9ef   :  { %2184 = vmatpush1.bf16.msra.mxu0 %v4157_v32 }
 0x9f0   :  { %2438 = vmatprep.subr.bf16.mxu0 %v4079_v16  ;;  %v3486_v16 = vld [vmem:[#allocation10 + $0x30] sm:$0xff]  }
 0x9f1   :  { %3272 = vmatpush3.bf16.msra.mxu1 %v3486_v16 }
 0x9f2   :  { %3273 = vmatprep.subr.bf16.mxu1 %v3776_v55 }
 0x9f5   :  { %3274 = vmatpush3.bf16.msra.mxu1 %v3487_v31 }
 0x9f6   :  { %3279 = vmatprep.subr.bf16.mxu1 %v3776_v55 }
 0xaa5   :  { %v1934_v27 = vpop.f32.mrb[20].mxu0 }
 0xaa6   :  { %v1941_v4 = vadd.f32 %v1934_v27, %v3998_v52  ;;  %v1936_v61 = vpop.f32.mrb[21].mxu0 }
 0xaa7   :  { %v1948_v18 = vadd.f32 %v1936_v61, %v4000_v54  ;;  %v1938_v63 = vpop.f32.mrb[22].mxu0 }
 0xaa8   :  { %v1939_v5 = vpop.f32.mrb[23].mxu0  ;;  %v2968_v1 = vmul.f32 -1.442695, %v1941_v4 }
 0xaa9   :  { %v2969_v11 = vmul.f32 -1.442695, %v1948_v18  ;;  %v2608_v18 = vld [vmem:[#allocation14 + $0x8] sm:$0xff] }
 0xaaa   :  { %v3497_v5 = vld [vmem:[#allocation12 + $0x8] sm:$0xff]  }
 0xaab   :  { %3562 = vpow2.f32 %v2969_v11 }
 0xab5   :  { %v3563_v13 = vpop.eup %3562 }
 0xab6   :  { %v1952_v15 = vadd.f32 1.0, %v3563_v13  ;;  %v3498_v13 = vld [vmem:[#allocation12 + $0x10] sm:$0xff]  }
 0xab8   :  { %3564 = vrcp.f32 %v1952_v15  ;;  %v3499_v15 = vld [vmem:[#allocation12 + $0x18] sm:$0xff]  }
 0xab9   :  { %3566 = vpow2.f32 %v2968_v1  ;;  %v3503_v1 = vld [vmem:[#allocation12 + $0x38] sm:$0xff]  }
 0xac2   :  { %v3565_v19 = vpop.eup %3564 }
 0xac3   :  { %v1955_v21 = vmul.f32 %v3565_v19, %v4203_v50  ;;  %v3567_v52 = vpop.eup %3566  ;;  %v3500_v19 = vld [vmem:[#allocation12 + $0x20] sm:$0xff]  }
 0xac4   :  { %v1945_v54 = vadd.f32 1.0, %v3567_v52  ;;  %v2609_v52 = vld [vmem:[#allocation14 + $0x10] sm:$0xff] }
 0xac5   :  { %v1956_v23 = vpack.c.bf16 %v1955_v21, %v1955_v21  ;;  %v3501_v21 = vld [vmem:[#allocation12 + $0x28] sm:$0xff]  }
 0xac7   :  { %3276 = vmatmul.mubr.bf16.vlgmr.msra.gmra.mrb[44].mxu1 %v1956_v23  ;;  %v3502_v23 = vld [vmem:[#allocation12 + $0x30] sm:$0xff]  }
 0xac8   :  { %3295 = vmatprep.mubr.msk.bf16.mxu1 %vm3777_vm0, %v3776_v55 }
 0xb9a   :  { %v2055_v20 = vpop.f32.mrb[44].mxu1 }
 0xb9b   :  { %v2061_v7 = vadd.f32 %v2055_v20, %v4024_v39  ;;  %v3277_v38 = vpop.f32.mrb[45].mxu1  ;;  %v3489_v39 = vld [vmem:[#allocation10 + $0x8] sm:$0xff]   ;;  %v2616_v20 = vpack.c.bf16 %v4165_v17, %v2609_v52  ;;  %v3508_v17 = vld [vmem:[#allocation10 + $0x20] sm:$0xff]  }
 0xb9c   :  { %v2058_v46 = vpop.f32.mrb[46].mxu1  ;;  %v3505_v38 = vld [vmem:[#allocation10 + $0x8] sm:$0xff]  }
 0xb9d   :  { %3568 = vtanh.f32 %v2061_v7  ;;  %v3278_v37 = vpop.f32.mrb[47].mxu1  ;;  %v3504_v7 = vld [vmem:[#allocation10] sm:$0xff]   ;;  %v3506_v46 = vld [vmem:[#allocation10 + $0x10] sm:$0xff]  }
 0xb9e   :  { %3570 = vrcp.f32 %v1945_v54  ;;  %v3507_v37 = vld [vmem:[#allocation10 + $0x18] sm:$0xff]  }
 0xba7   :  { %v3569_v49 = vpop.eup %3568 }
 0xba8   :  { %v2063_v40 = vsub.f32 %v3569_v49, %v4203_v50  ;;  %v3571_v29 = vpop.eup %3570  ;;  %v3510_v49 = vld [vmem:[#allocation10 + $0x30] sm:$0xff]  }
 0xbaa   :  { %v2064_v41 = vmul.f32 %v3571_v29, %v2063_v40  ;;  %v3511_v40 = vld [vmem:[#allocation10 + $0x38] sm:$0xff]  }
 0xbac   :  { %v4241_v35 = vadd.f32 %v2064_v41, %v4203_v50 }
 0xbae   :  { %2067 = vst [vmem:[#allocation14 + $0x28] sm:$0xff] %v4241_v35  ;;  %v2072_v43 = vpack.c.bf16 %v4241_v35, %v4241_v35  ;;  %v2617_v54 = vpack.c.bf16 %v4241_v35, %v4203_v50  ;;  %v3509_v50 = vld [vmem:[#allocation10 + $0x28] sm:$0xff]  }
 0xbb0   :  { %2202 = vmatmul.mubr.bf16.vlgmr.msra.gmra.mrb[24].mxu0 %v2072_v43 }
 0xbb1   :  { %2439 = vmatpush1.bf16.msra.mxu0 %v4077_v14  ;;  %2470 = vmatprep.mubr.bf16.mxu0 %v3774_v0  ;;  %v3488_v0 = vld [vmem:[#allocation10] sm:$0xff]   ;;  %v3490_v14 = vld [vmem:[#allocation10 + $0x10] sm:$0xff]  }
 0xbb2   :  { %2440 = vmatprep.subr.bf16.mxu0 %v4116_v8  ;;  %3280 = vmatpush3.bf16.msra.mxu1 %v3488_v0  ;;  %v3492_v8 = vld [vmem:[#allocation10 + $0x20] sm:$0xff]  }
 0xbb3   :  { %3281 = vmatprep.subr.bf16.mxu1 %v3776_v55 }
 0xbb5   :  { %2441 = vmatpush1.bf16.msra.mxu0 %v4114_v6  ;;  %v3491_v6 = vld [vmem:[#allocation10 + $0x18] sm:$0xff]  }
 0xbb6   :  { %2442 = vmatprep.subr.bf16.mxu0 %v4118_v10  ;;  %3282 = vmatpush3.bf16.msra.mxu1 %v3489_v39  ;;  %v3493_v10 = vld [vmem:[#allocation10 + $0x28] sm:$0xff]  }
 0xbb7   :  { %3283 = vmatprep.subr.bf16.mxu1 %v3776_v55 }
 0xbb9   :  { %2443 = vmatpush1.bf16.msra.mxu0 %v4122_v12  ;;  %v3494_v12 = vld [vmem:[#allocation10 + $0x30] sm:$0xff]  }
 0xbba   :  { %2444 = vmatprep.subr.bf16.mxu0 %v4131_v22  ;;  %3284 = vmatpush3.bf16.msra.mxu1 %v3490_v14  ;;  %v3495_v22 = vld [vmem:[#allocation10 + $0x38] sm:$0xff]  }
 0xbbb   :  { %3285 = vmatprep.subr.bf16.mxu1 %v3776_v55 }
 0xbbd   :  { %2445 = vmatpush1.bf16.msra.mxu0 %v4133_v42 }
 0xbbe   :  { %2446 = vmatprep.subr.bf16.mxu0 %v4137_v44  ;;  %3286 = vmatpush3.bf16.msra.mxu1 %v3491_v6 }
 0xbbf   :  { %3287 = vmatprep.subr.bf16.mxu1 %v3776_v55 }
 0xbc1   :  { %2447 = vmatpush1.bf16.msra.mxu0 %v4139_v3 }
 0xbc2   :  { %2448 = vmatprep.subr.bf16.mxu0 %v4143_v24  ;;  %3288 = vmatpush3.bf16.msra.mxu1 %v3492_v8 }
 0xbc3   :  { %3289 = vmatprep.subr.bf16.mxu1 %v3776_v55 }
 0xbc5   :  { %2449 = vmatpush1.bf16.msra.mxu0 %v4145_v26 }
 0xbc6   :  { %2450 = vmatprep.subr.bf16.mxu0 %v4149_v28  ;;  %3290 = vmatpush3.bf16.msra.mxu1 %v3493_v10 }
 0xbc7   :  { %3291 = vmatprep.subr.bf16.mxu1 %v3776_v55 }
 0xbc9   :  { %2451 = vmatpush1.bf16.msra.mxu0 %v4151_v30 }
 0xbca   :  { %2452 = vmatprep.subr.bf16.mxu0 %v4155_v34  ;;  %3292 = vmatpush3.bf16.msra.mxu1 %v3494_v12  ;;  %v3030_v12 = vld [vmem:[%s4339_s6] ss:$0 sm:$0xff]  ;;  %s3778_s6 = smov [#allocation14]  }
 0xbcb   :  { %3293 = vmatprep.subr.bf16.mxu1 %v3776_v55  ;;  %s2780_s25 = sshll.u32 %s3778_s6, 4  ;;  %s2781_s25 = int_to_ptr.vmem [resolvable:$true] %s2780_s25 }
 0xbcc   :  { %s3709_s26 = scalar_lea.vmem %s2781_s25, 1024  ;;  %p3714_p13 = scmp.lt.s32.totalorder %s2781_s25, %s2781_s25 }
 0xbcd   :  { %2453 = vmatpush1.bf16.msra.mxu0 %v4157_v32  ;;  %p3710_p12 = scmp.ne.s32.totalorder %s2781_s25, %s3709_s26  ;;  %p3715_p0 = scmp.lt.s32.totalorder %s3709_s26, %s3709_s26 }
 0xbce   :  { %3294 = vmatpush3.bf16.msra.mxu1 %v3495_v22  ;;  %3319 = vmatprep.subr.bf16.mxu0 %v3496_v53 }
 0xbcf   :  { %3299 = vmatprep.subr.bf16.mxu1 %v3776_v55  ;;  %p3716_p1 = por %p3715_p0, %p3714_p13 }
 0xbd1   :  { %p3717_p2 = pnand %p3716_p1, %p3710_p12 }
 0xc83   :  { %v2203_v42 = vpop.f32.mrb[24].mxu0 }
 0xc84   :  { %v2210_v44 = vadd.f32 %v2203_v42, %v4002_v57  ;;  %v2205_v3 = vpop.f32.mrb[25].mxu0 }
 0xc85   :  { %v2217_v24 = vadd.f32 %v2205_v3, %v4004_v60  ;;  %v2207_v26 = vpop.f32.mrb[26].mxu0 }
 0xc86   :  { %v2208_v28 = vpop.f32.mrb[27].mxu0  ;;  %v2994_v57 = vmul.f32 -1.442695, %v2210_v44 }
 0xc87   :  { %v2995_v30 = vmul.f32 -1.442695, %v2217_v24 }
 0xc89   :  { %3572 = vpow2.f32 %v2995_v30 }
 0xc93   :  { %v3573_v34 = vpop.eup %3572 }
 0xc94   :  { %v2221_v32 = vadd.f32 1.0, %v3573_v34 }
 0xc96   :  { %3574 = vrcp.f32 %v2221_v32 }
 0xc97   :  { %3576 = vpow2.f32 %v2994_v57 }
 0xca0   :  { %v3575_v45 = vpop.eup %3574 }
 0xca1   :  { %v2224_v47 = vmul.f32 %v3575_v45, %v4241_v35  ;;  %v3577_v60 = vpop.eup %3576 }
 0xca2   :  { %v2214_v56 = vadd.f32 1.0, %v3577_v60 }
 0xca3   :  { %v2225_v48 = vpack.c.bf16 %v2224_v47, %v2224_v47 }
 0xca5   :  { %3296 = vmatmul.mubr.bf16.vlgmr.msra.gmra.mrb[48].mxu1 %v2225_v48 }
 0xca6   :  { %3315 = vmatprep.mubr.msk.bf16.mxu1 %vm3777_vm0, %v3776_v55  ;;  %3300 = vmatpush3.bf16.msra.mxu1 %v3504_v7 }
 0xca7   :  { %3301 = vmatprep.subr.bf16.mxu1 %v3776_v55 }
 0xcaa   :  { %3302 = vmatpush3.bf16.msra.mxu1 %v3505_v38 }
 0xcab   :  { %3303 = vmatprep.subr.bf16.mxu1 %v3776_v55 }
 0xcae   :  { %3304 = vmatpush3.bf16.msra.mxu1 %v3506_v46 }
 0xcaf   :  { %3305 = vmatprep.subr.bf16.mxu1 %v3776_v55 }
 0xcb2   :  { %3306 = vmatpush3.bf16.msra.mxu1 %v3507_v37 }
 0xcb3   :  { %3307 = vmatprep.subr.bf16.mxu1 %v3776_v55 }
 0xcb6   :  { %3308 = vmatpush3.bf16.msra.mxu1 %v3508_v17 }
 0xcb7   :  { %3309 = vmatprep.subr.bf16.mxu1 %v3776_v55 }
 0xcba   :  { %3310 = vmatpush3.bf16.msra.mxu1 %v3509_v50 }
 0xcbb   :  { %3311 = vmatprep.subr.bf16.mxu1 %v3776_v55 }
 0xcbe   :  { %3312 = vmatpush3.bf16.msra.mxu1 %v3510_v49 }
 0xcbf   :  { %3313 = vmatprep.subr.bf16.mxu1 %v3776_v55 }
 0xcc2   :  { %3314 = vmatpush3.bf16.msra.mxu1 %v3511_v40 }
 0xd78   :  { %v2324_v33 = vpop.f32.mrb[48].mxu1 }
 0xd79   :  { %v2330_v25 = vadd.f32 %v2324_v33, %v4018_v9  ;;  %v3297_v51 = vpop.f32.mrb[49].mxu1  ;;  %v2607_v9 = vld [vmem:[#allocation14] sm:$0xff] }
 0xd7a   :  { %v2327_v58 = vpop.f32.mrb[50].mxu1  ;;  %v2615_v11 = vpack.c.bf16 %v2608_v18, %v2607_v9 }
 0xd7b   :  { %3578 = vtanh.f32 %v2330_v25  ;;  %v3298_v59 = vpop.f32.mrb[51].mxu1 }
 0xd7c   :  { %3580 = vrcp.f32 %v2214_v56 }
 0xd85   :  { %v3579_v16 = vpop.eup %3578 }
 0xd86   :  { %v2332_v31 = vsub.f32 %v3579_v16, %v4241_v35  ;;  %v3581_v27 = vpop.eup %3580 }
 0xd88   :  { %v2333_v4 = vmul.f32 %v3581_v27, %v2332_v31 }
 0xd8a   :  { %v4278_v61 = vadd.f32 %v2333_v4, %v4241_v35 }
 0xd8c   :  { %2336 = vst [vmem:[#allocation14 + $0x30] sm:$0xff] %v4278_v61  ;;  %v2341_v63 = vpack.c.bf16 %v4278_v61, %v4278_v61 }
 0xd8e   :  { %2471 = vmatmul.mubr.bf16.vlgmr.msra.gmra.mrb[28].mxu0 %v2341_v63 }
 0xd8f   :  { %3320 = vmatpush3.bf16.msra.mxu0 %v3496_v53  ;;  %3335 = vmatprep.mubr.bf16.mxu0 %v2615_v11 }
 0xd90   :  { %3321 = vmatprep.subr.bf16.mxu0 %v3497_v5 }
 0xd93   :  { %3322 = vmatpush3.bf16.msra.mxu0 %v3497_v5 }
 0xd94   :  { %3323 = vmatprep.subr.bf16.mxu0 %v3498_v13 }
 0xd97   :  { %3324 = vmatpush3.bf16.msra.mxu0 %v3498_v13 }
 0xd98   :  { %3325 = vmatprep.subr.bf16.mxu0 %v3499_v15 }
 0xd9b   :  { %3326 = vmatpush3.bf16.msra.mxu0 %v3499_v15 }
 0xd9c   :  { %3327 = vmatprep.subr.bf16.mxu0 %v3500_v19 }
 0xd9f   :  { %3328 = vmatpush3.bf16.msra.mxu0 %v3500_v19 }
 0xda0   :  { %3329 = vmatprep.subr.bf16.mxu0 %v3501_v21 }
 0xda3   :  { %3330 = vmatpush3.bf16.msra.mxu0 %v3501_v21 }
 0xda4   :  { %3331 = vmatprep.subr.bf16.mxu0 %v3502_v23 }
 0xda7   :  { %3332 = vmatpush3.bf16.msra.mxu0 %v3502_v23 }
 0xda8   :  { %3333 = vmatprep.subr.bf16.mxu0 %v3503_v1 }
 0xdab   :  { %3334 = vmatpush3.bf16.msra.mxu0 %v3503_v1 }
 0xdae   :  { %3336 = vmatmul.mubr.bf16.vlgmr.msra.gmra.mrb[32].mxu0 %v2616_v20 }
 0xdaf   :  { %3339 = vmatprep.mubr.bf16.mxu0 %v2617_v54 }
 0xe61   :  { %v2472_v29 = vpop.f32.mrb[28].mxu0 }
 0xe62   :  { %v2479_v41 = vadd.f32 %v2472_v29, %v4006_v62  ;;  %v2474_v35 = vpop.f32.mrb[29].mxu0 }
 0xe63   :  { %v2486_v43 = vadd.f32 %v2474_v35, %v4008_v2  ;;  %v2476_v0 = vpop.f32.mrb[30].mxu0 }
 0xe64   :  { %v2477_v39 = vpop.f32.mrb[31].mxu0  ;;  %v3020_v30 = vmul.f32 -1.442695, %v2479_v41 }
 0xe65   :  { %v3021_v14 = vmul.f32 -1.442695, %v2486_v43 }
 0xe67   :  { %3582 = vpow2.f32 %v3021_v14 }
 0xe71   :  { %v3583_v6 = vpop.eup %3582 }
 0xe72   :  { %v2490_v8 = vadd.f32 1.0, %v3583_v6 }
 0xe74   :  { %3584 = vrcp.f32 %v2490_v8 }
 0xe75   :  { %3586 = vpow2.f32 %v3020_v30 }
 0xe7e   :  { %v3585_v10 = vpop.eup %3584 }
 0xe7f   :  { %v2493_v55 = vmul.f32 %v3585_v10, %v4278_v61  ;;  %v3587_v34 = vpop.eup %3586 }
 0xe80   :  { %v2483_v45 = vadd.f32 1.0, %v3587_v34 }
 0xe81   :  { %v3337_v22 = vpop.f32.mrb[32].mxu0  ;;  %v2494_v42 = vpack.c.bf16 %v2493_v55, %v2493_v55 }
 0xe82   :  { %v2733_v62 = vadd.f32 %v3337_v22, %v3030_v12  ;;  %v2724_v44 = vpop.f32.mrb[33].mxu0 }
 0xe83   :  { %v2725_v3 = vadd.f32 %v3030_v12, %v2724_v44  ;;  %v3338_v2 = vpop.f32.mrb[34].mxu0  ;;  %3316 = vmatmul.mubr.bf16.vlgmr.msra.gmra.mrb[52].mxu1 %v2494_v42 }
 0xe84   :  { %2757 = vst [vmem:[#allocation13 + $0x10] sm:$0xff] %v2733_v62  ;;  %v2736_v24 = vadd.f32 %v3338_v2, %v3030_v12  ;;  %v2727_v26 = vpop.f32.mrb[35].mxu0 }
 0xe85   :  { %2755 = vst [vmem:[#allocation13] sm:$0xff] %v2725_v3  ;;  %v2728_v28 = vadd.f32 %v3030_v12, %v2727_v26 }
 0xe86   :  { %2758 = vst [vmem:[#allocation13 + $0x18] sm:$0xff] %v2736_v24 }
 0xe87   :  { %2756 = vst [vmem:[#allocation13 + $0x8] sm:$0xff] %v2728_v28 }
 0xf56   :  { %v2593_v32 = vpop.f32.mrb[52].mxu1 }
 0xf57   :  { %v2599_v47 = vadd.f32 %v2593_v32, %v4022_v36  ;;  %v3317_v48 = vpop.f32.mrb[53].mxu1 }
 0xf58   :  { %v2596_v53 = vpop.f32.mrb[54].mxu1 }
 0xf59   :  { %3588 = vtanh.f32 %v2599_v47  ;;  %v3318_v57 = vpop.f32.mrb[55].mxu1 }
 0xf5a   :  { %3590 = vrcp.f32 %v2483_v45 }
 0xf63   :  { %v3589_v60 = vpop.eup %3588 }
 0xf64   :  { %v2601_v33 = vsub.f32 %v3589_v60, %v4278_v61  ;;  %v3591_v56 = vpop.eup %3590 }
 0xf66   :  { %v2602_v25 = vmul.f32 %v3591_v56, %v2601_v33 }
 0xf68   :  { %v2603_v51 = vadd.f32 %v2602_v25, %v4278_v61 }
 0xf6a   :  { %2605 = vst [vmem:[#allocation14 + $0x38] sm:$0xff] %v2603_v51  ;;  %v2618_v58 = vpack.c.bf16 %v2603_v51, %v4278_v61 }
 0xf6c   :  { %3340 = vmatmul.mubr.bf16.gmra.mrb[36].mxu0 %v2618_v58 }
 0xf6d   :  { %3720 = shalt.err (!%p3717_p2)
}
 0xf6e   :  { %s3721_s30 = scalar_lea.hbm %s4341_s8, 1024 }
 0xf6f   :  { %p3722_p3 = scmp.ne.s32.totalorder %s4341_s8, %s3721_s30  ;;  %p3725_p4 = scmp.lt.u32.totalorder %s3721_s30, %s4341_s8 }
 0xf71   :  { %p3727_p5 = pnand %p3725_p4, %p3722_p3 }
 0xf73   :  { %3730 = shalt.err (!%p3727_p5)
}
 0xf74   :  { %2786 = dma.vmem_to_hbm [thread:$0]  %s2781_s25, 1024, %s4341_s8, [#allocation15], %s3770_s4, %s3770_s4, %s3771_s20  }
 0xf75   :  { %s3779_s14 = smov [#allocation13]  }
 0xf76   :  { %s2768_s15 = sshll.u32 %s3779_s14, 4  ;;  %s2769_s15 = int_to_ptr.vmem [resolvable:$true] %s2768_s15 }
 0xf77   :  { %s3731_s16 = scalar_lea.vmem %s2769_s15, 1024  ;;  %p3736_p7 = scmp.lt.s32.totalorder %s2769_s15, %s2769_s15 }
 0xf78   :  { %p3732_p6 = scmp.ne.s32.totalorder %s2769_s15, %s3731_s16  ;;  %p3737_p8 = scmp.lt.s32.totalorder %s3731_s16, %s3731_s16 }
 0xf7a   :  { %p3738_p9 = por %p3737_p8, %p3736_p7 }
 0xf7c   :  { %p3739_p10 = pnand %p3738_p9, %p3732_p6 }
0x103f   :  { %v3341_v36 = vpop.f32.mrb[36].mxu0 }
0x1040   :  { %v2749_v59 = vadd.f32 %v3341_v36, %v3030_v12  ;;  %v2740_v16 = vpop.f32.mrb[37].mxu0 }
0x1041   :  { %v2741_v31 = vadd.f32 %v3030_v12, %v2740_v16  ;;  %v3342_v27 = vpop.f32.mrb[38].mxu0 }
0x1042   :  { %2761 = vst [vmem:[#allocation13 + $0x30] sm:$0xff] %v2749_v59  ;;  %v2752_v4 = vadd.f32 %v3342_v27, %v3030_v12  ;;  %v2743_v61 = vpop.f32.mrb[39].mxu0 }
0x1043   :  { %2759 = vst [vmem:[#allocation13 + $0x20] sm:$0xff] %v2741_v31  ;;  %v2744_v18 = vadd.f32 %v3030_v12, %v2743_v61 }
0x1044   :  { %2762 = vst [vmem:[#allocation13 + $0x38] sm:$0xff] %v2752_v4 }
0x1045   :  { %2760 = vst [vmem:[#allocation13 + $0x28] sm:$0xff] %v2744_v18 }
0x1046   :  { %3742 = shalt.err (!%p3739_p10)
}
0x1047   :  { %s3743_s18 = scalar_lea.hbm %s4340_s7, 1024 }
0x1048   :  { %p3744_p11 = scmp.ne.s32.totalorder %s4340_s7, %s3743_s18  ;;  %p3747_p12 = scmp.lt.u32.totalorder %s3743_s18, %s4340_s7 }
0x104a   :  { %p3749_p13 = pnand %p3747_p12, %p3744_p11 }
0x104c   :  { %3752 = shalt.err (!%p3749_p13)
}
0x104d   :  { %2774 = dma.vmem_to_hbm [thread:$0]  %s2769_s15, 1024, %s4340_s7, [#allocation6], %s3770_s4, %s3770_s4, %s3771_s20  }
0x104e   :  { %3759 = dma.done.wait [#allocation6], 1024  }
0x104f   :  { %3760 = vsyncadd [#allocation6], 4294966272 }
0x1050   :  { %3761 = dma.done.wait [#allocation15], 1024  }
0x1051   :  { %3762 = vsyncadd [#allocation15], 4294966272 }
0x1052   :  { %2793 = vsyncpa [#allocation5], 1 }
0x1053   :  { %2794 = vsyncpa [#allocation8], 1 }
0x1054   :  { %2795 = vsyncpa [#allocation11], 1 }
0x1055   :  { %2796 = vsyncpa [#allocation6], 1 }
0x1056   :  { %2797 = vsyncpa [#allocation15], 1 }

</bundles_post_ra>
